<compile_context>
chip_gen: v7x
topology: tpu7x:2x2x1
jax: 0.10.0
libtpu: 0.0.40
codegen_flags: <defaults>
</compile_context>

<pallas_src>
import functools

import numpy as np
import jax
import jax.numpy as jnp
from jax.experimental import pallas as pl
from jax.experimental.pallas import tpu as pltpu

# ----- model hyperparameters (small, consistent with the module) -----
VOCAB = 100
SEQ = 22               # forced by dense_1 in_features = 22 * cnn_out_dim
EMB = 32               # embedding_dim
CNN = 16               # cnn_out_dim
HID = 256              # dense_1 output (folded away at load time)
NUM_LABEL = 8
BATCH = 2
KW = 3                 # TextCnn kernel width, padding='same'

LANE = 128             # TPU vreg lane width
PADLEN = SEQ + 2       # padded sequence length for k=3 'same'
PADW = PADLEN * EMB    # 768 = flattened padded-embedding width (divisible by LANE)
NBLK = PADW // LANE    # 6 lane-aligned 128-wide blocks per batch row
S_PER_BLK = LANE // EMB  # 4 padded positions per 128-lane block
CONV_OUT = SEQ * CNN   # 352 = channel-major flattened conv output
assert PADW % LANE == 0 and LANE % EMB == 0


def charmodel_kernel(ids_ref, embed_ref, wexp_hbm, bcx_ref, w12_ref, b12_ref,
                     out_ref, wexp_vmem, dma_sem):
    # ids_ref   : SMEM (BATCH*SEQ,) int32        scalar-prefetched token ids
    # embed_ref : VMEM (VOCAB, 1, LANE) f32      embedding rows zero-padded to 128 lanes
    # wexp_hbm  : HBM  (PADW, CONV_OUT) bf16     banded (Toeplitz) conv weights (manual DMA)
    # bcx_ref   : VMEM (1, CONV_OUT) f32         conv bias, channel-major expanded
    # w12_ref   : VMEM (CONV_OUT, NUM_LABEL) bf16   folded dense_1 @ dense_2
    # b12_ref   : VMEM (1, NUM_LABEL) f32           folded bias
    # out_ref   : VMEM (BATCH, NUM_LABEL) f32
    # wexp_vmem : VMEM scratch (PADW, CONV_OUT) bf16
    # dma_sem   : DMA semaphore

    # ---- kick off the big conv-weight DMA; the gather below hides under it ----
    wexp_cp = pltpu.make_async_copy(wexp_hbm, wexp_vmem, dma_sem)
    wexp_cp.start()

    # ---- fused embedding gather + 'same' zero padding (all in vregs) ---------
    # Each batch row is assembled in the flattened (PADLEN*EMB) lane layout,
    # 128 lanes (= S_PER_BLK positions) at a time; each row placement is a
    # single-vreg static lane rotate.  Accumulation stays f32 (v5e VPU).
    # TODO(synk): if the bundle dump shows vreg spills from this full unroll,
    # bound live ranges with lax.fori_loop(..., unroll=True) per 128-lane block.
    rows = []
    for b in range(BATCH):
        blks = []
        for blk in range(NBLK):
            acc = jnp.zeros((1, LANE), jnp.float32)
            for j in range(S_PER_BLK):
                s = blk * S_PER_BLK + j               # padded sequence position
                if 1 <= s <= SEQ:                     # s == 0 / PADLEN-1 stay zero ('same' pad)
                    row = embed_ref[ids_ref[b * SEQ + (s - 1)]]   # (1, LANE), data in lanes [0, EMB)
                    off = (s * EMB) % LANE
                    if off:
                        row = pltpu.roll(row, shift=off, axis=1)
                    acc = acc + row
            blks.append(acc)
        rows.append(jnp.concatenate(blks, axis=1))    # (1, PADW), lane-aligned pieces
    xp = jnp.concatenate(rows, axis=0).astype(jnp.bfloat16)       # (BATCH, PADW)

    # ---- Conv1d(k=3, 'same') + ReLU as ONE MXU matmul ------------------------
    # wexp's columns are ordered channel-major (c*SEQ + t), i.e. exactly
    # PyTorch's Conv1d output (B, C, L).reshape(B, -1).
    wexp_cp.wait()
    h = jnp.dot(xp, wexp_vmem[...], preferred_element_type=jnp.float32) + bcx_ref[...]
    h = jnp.maximum(h, 0.0)                                        # (BATCH, CONV_OUT)

    # ---- folded dense_1 . dense_2 as one matmul ------------------------------
    y = jnp.dot(h.astype(jnp.bfloat16), w12_ref[...],
                preferred_element_type=jnp.float32) + b12_ref[...]
    out_ref[...] = y.astype(out_ref.dtype)


def _prepare_operands(params):
    """ONE-TIME (model-load) weight re-layout / fold / quantization."""
    embed_tbl, wc, bc, w1, b1, w2, b2 = params

    # Embedding rows zero-padded to a full vreg lane width so a gathered row can
    # be placed with a single-vreg pltpu.roll inside the kernel (kept f32).
    embed_pad = jnp.pad(embed_tbl.astype(jnp.float32),
                        ((0, 0), (0, LANE - EMB))).reshape(VOCAB, 1, LANE)

    # Banded (Toeplitz) expansion of the 3 conv taps:
    #   wexp[(t+k)*EMB + e, c*SEQ + t] = wc[k, e, c]
    # so conv1d(k=3,'same') becomes a single (B, PADW) x (PADW, CONV_OUT) matmul
    # whose output is already the channel-major flattening expected by dense_1.
    wc_np = np.asarray(wc, np.float32)
    wexp_np = np.zeros((PADW, CONV_OUT), np.float32)
    for k in range(KW):
        for t in range(SEQ):
            wexp_np[(t + k) * EMB:(t + k + 1) * EMB, t::SEQ] = wc_np[k]
    wexp = jnp.asarray(wexp_np, dtype=jnp.bfloat16)

    bcx = jnp.repeat(bc.astype(jnp.float32), SEQ).reshape(1, CONV_OUT)  # bcx[0, c*SEQ+t] = bc[c]

    # Fold dense_1 into dense_2 (no activation between them in the module).
    w1f = jnp.asarray(w1, jnp.float32)
    w2f = jnp.asarray(w2, jnp.float32)
    w12 = (w1f @ w2f).astype(jnp.bfloat16)                               # (CONV_OUT, NUM_LABEL)
    b12 = (jnp.asarray(b1, jnp.float32) @ w2f
           + jnp.asarray(b2, jnp.float32)).reshape(1, NUM_LABEL)

    return (embed_pad, wexp, bcx, w12, b12)


def _charmodel_pallas(x_ids, ops):
    embed_pad, wexp, bcx, w12, b12 = ops
    ids_flat = x_ids.reshape(-1).astype(jnp.int32)        # (BATCH*SEQ,) -> SMEM scalar prefetch

    grid_spec = pltpu.PrefetchScalarGridSpec(
        num_scalar_prefetch=1,
        grid=(1,),                                        # single fused invocation (whole batch)
        in_specs=[
            pl.BlockSpec((VOCAB, 1, LANE), lambda i, ids: (0, 0, 0)),      # embedding table
            pl.BlockSpec(memory_space=pl.ANY),                              # wexp stays in HBM
            pl.BlockSpec((1, CONV_OUT), lambda i, ids: (0, 0)),            # conv bias
            pl.BlockSpec((CONV_OUT, NUM_LABEL), lambda i, ids: (0, 0)),    # folded dense W
            pl.BlockSpec((1, NUM_LABEL), lambda i, ids: (0, 0)),           # folded dense b
        ],
        out_specs=pl.BlockSpec((BATCH, NUM_LABEL), lambda i, ids: (0, 0)),
        scratch_shapes=[
            pltpu.VMEM((PADW, CONV_OUT), jnp.bfloat16),   # landing buffer for wexp DMA
            pltpu.SemaphoreType.DMA,
        ],
    )

    return pl.pallas_call(
        charmodel_kernel,
        out_shape=jax.ShapeDtypeStruct((BATCH, NUM_LABEL), jnp.float32),
        grid_spec=grid_spec,
        compiler_params=pltpu.CompilerParams(dimension_semantics=("arbitrary",)),
    )(ids_flat, embed_pad, wexp, bcx, w12, b12)


def make_charmodel_forward(params):
    """Model-load-time prep (weight fold / bf16 / Toeplitz build) + jitted forward."""
    ops = _prepare_operands(params)
    return jax.jit(functools.partial(_charmodel_pallas, ops=ops))


def reference_forward(x_ids, params):
    embed_tbl, wc, bc, w1, b1, w2, b2 = params
    B = x_ids.shape[0]
    emb = embed_tbl[x_ids]                                # (B, SEQ, EMB), frozen lookup
    emb_pad = jnp.pad(emb, ((0, 0), (1, 1), (0, 0)))      # 'same' padding for k=3
    h = sum(jnp.einsum("bte,ec->btc", emb_pad[:, k:k + SEQ, :], wc[k])
            for k in range(KW)) + bc
    h = jnp.maximum(h, 0.0)                               # (B, SEQ, CNN)
    # PyTorch: Conv1d output is (B, CNN, SEQ); x.reshape(B, -1) is channel-major.
    flat = jnp.transpose(h, (0, 2, 1)).reshape(B, SEQ * CNN)
    y1 = flat @ w1 + b1
    return y1 @ w2 + b2


def init_params(key):
    ks = jax.random.split(key, 7)
    embed_tbl = jax.random.normal(ks[0], (VOCAB, EMB), jnp.float32) * 0.1
    wc = jax.random.normal(ks[1], (KW, EMB, CNN), jnp.float32) * 0.1
    bc = jax.random.normal(ks[2], (CNN,), jnp.float32) * 0.1
    w1 = jax.random.normal(ks[3], (SEQ * CNN, HID), jnp.float32) * 0.05
    b1 = jax.random.normal(ks[4], (HID,), jnp.float32) * 0.05
    w2 = jax.random.normal(ks[5], (HID, NUM_LABEL), jnp.float32) * 0.05
    b2 = jax.random.normal(ks[6], (NUM_LABEL,), jnp.float32) * 0.05
    return (embed_tbl, wc, bc, w1, b1, w2, b2)


if __name__ == "__main__":
    key = jax.random.PRNGKey(0)
    pkey, xkey = jax.random.split(key)
    params = init_params(pkey)
    # TODO(synk): FastEmbedding/TextCnn sources are not provided; assumed a frozen
    # (fine_tune=False) embedding lookup + a single Conv1d(k=3, padding='same')+ReLU
    # that preserves sequence length 22 (as dense_1's 22*cnn_out_dim input implies).
    x_ids = jax.random.randint(xkey, (BATCH, SEQ), 0, VOCAB, dtype=jnp.int32)

    forward = make_charmodel_forward(params)   # one-time weight prep + jit
    out = jax.block_until_ready(forward(x_ids))
    ref = jax.block_until_ready(reference_forward(x_ids, params))

    assert out.shape == (BATCH, NUM_LABEL)
    # bf16 weights/activations on the matmul path -> loosened tolerance vs f32 ref.
    assert jnp.allclose(out, ref, atol=3e-2, rtol=3e-2), (out, ref)
    print("KERNEL_OK")
</pallas_src>

<mosaic_0001>
module attributes {stable_mosaic.version = 11 : i64} {
  func.func @charmodel_kernel(%arg0: i32, %arg1: memref<44xi32, #tpu.memory_space<smem>>, %arg2: memref<100x1x128xf32, #tpu.memory_space<vmem>>, %arg3: memref<768x352xbf16, #tpu.memory_space<any>>, %arg4: memref<1x352xf32, #tpu.memory_space<vmem>>, %arg5: memref<352x8xbf16, #tpu.memory_space<vmem>>, %arg6: memref<1x8xf32, #tpu.memory_space<vmem>>, %arg7: memref<2x8xf32, #tpu.memory_space<vmem>>, %arg8: memref<768x352xbf16, #tpu.memory_space<vmem>>, %arg9: memref<!tpu.dma_semaphore, #tpu.memory_space<semaphore_mem>>) attributes {dimension_semantics = [#tpu.dimension_semantics<arbitrary>], iteration_bounds = array<i64: 1>, scalar_prefetch = 1 : i64, scratch_operands = 2 : i64, tpu.core_type = #tpu.core_type<tc>, window_params = [{pipeline_mode = #tpu.pipeline_mode<synchronous>, transform_indices = @transform_0, window_bounds = array<i64: 100, 1, 128>}, {}, {pipeline_mode = #tpu.pipeline_mode<synchronous>, transform_indices = @transform_2, window_bounds = array<i64: 1, 352>}, {pipeline_mode = #tpu.pipeline_mode<synchronous>, transform_indices = @transform_3, window_bounds = array<i64: 352, 8>}, {pipeline_mode = #tpu.pipeline_mode<synchronous>, transform_indices = @transform_4, window_bounds = array<i64: 1, 8>}, {pipeline_mode = #tpu.pipeline_mode<synchronous>, transform_indices = @transform_5, window_bounds = array<i64: 2, 8>}]} {
    tpu.enqueue_dma source(%arg3 : memref<768x352xbf16, #tpu.memory_space<any>>) target(%arg8 : memref<768x352xbf16, #tpu.memory_space<vmem>>) target_semaphore(%arg9 : memref<!tpu.dma_semaphore, #tpu.memory_space<semaphore_mem>>)
    %cst = arith.constant 0.000000e+00 : f32
    %0 = vector.broadcast %cst : f32 to vector<1x128xf32>
    %c0 = arith.constant 0 : index
    %1 = memref.load %arg1[%c0] : memref<44xi32, #tpu.memory_space<smem>>
    %2 = arith.index_cast %1 : i32 to index
    %c0_0 = arith.constant 0 : index
    %c0_1 = arith.constant 0 : index
    %3 = vector.load %arg2[%2, %c0_0, %c0_1] : memref<100x1x128xf32, #tpu.memory_space<vmem>>, vector<1x1x128xf32>
    %4 = vector.shape_cast %3 : vector<1x1x128xf32> to vector<1x128xf32>
    %c32_i32 = arith.constant 32 : i32
    %5 = tpu.dynamic_rotate %4 by %c32_i32 dim 1 : vector<1x128xf32>, i32 -> vector<1x128xf32>
    %6 = arith.addf %0, %5 : vector<1x128xf32>
    %c1 = arith.constant 1 : index
    %7 = memref.load %arg1[%c1] : memref<44xi32, #tpu.memory_space<smem>>
    %8 = arith.index_cast %7 : i32 to index
    %c0_2 = arith.constant 0 : index
    %c0_3 = arith.constant 0 : index
    %9 = vector.load %arg2[%8, %c0_2, %c0_3] : memref<100x1x128xf32, #tpu.memory_space<vmem>>, vector<1x1x128xf32>
    %10 = vector.shape_cast %9 : vector<1x1x128xf32> to vector<1x128xf32>
    %c64_i32 = arith.constant 64 : i32
    %11 = tpu.dynamic_rotate %10 by %c64_i32 dim 1 : vector<1x128xf32>, i32 -> vector<1x128xf32>
    %12 = arith.addf %6, %11 : vector<1x128xf32>
    %c2 = arith.constant 2 : index
    %13 = memref.load %arg1[%c2] : memref<44xi32, #tpu.memory_space<smem>>
    %14 = arith.index_cast %13 : i32 to index
    %c0_4 = arith.constant 0 : index
    %c0_5 = arith.constant 0 : index
    %15 = vector.load %arg2[%14, %c0_4, %c0_5] : memref<100x1x128xf32, #tpu.memory_space<vmem>>, vector<1x1x128xf32>
    %16 = vector.shape_cast %15 : vector<1x1x128xf32> to vector<1x128xf32>
    %c96_i32 = arith.constant 96 : i32
    %17 = tpu.dynamic_rotate %16 by %c96_i32 dim 1 : vector<1x128xf32>, i32 -> vector<1x128xf32>
    %18 = arith.addf %12, %17 : vector<1x128xf32>
    %cst_6 = arith.constant 0.000000e+00 : f32
    %19 = vector.broadcast %cst_6 : f32 to vector<1x128xf32>
    %c3 = arith.constant 3 : index
    %20 = memref.load %arg1[%c3] : memref<44xi32, #tpu.memory_space<smem>>
    %21 = arith.index_cast %20 : i32 to index
    %c0_7 = arith.constant 0 : index
    %c0_8 = arith.constant 0 : index
    %22 = vector.load %arg2[%21, %c0_7, %c0_8] : memref<100x1x128xf32, #tpu.memory_space<vmem>>, vector<1x1x128xf32>
    %23 = vector.shape_cast %22 : vector<1x1x128xf32> to vector<1x128xf32>
    %24 = arith.addf %19, %23 : vector<1x128xf32>
    %c4 = arith.constant 4 : index
    %25 = memref.load %arg1[%c4] : memref<44xi32, #tpu.memory_space<smem>>
    %26 = arith.index_cast %25 : i32 to index
    %c0_9 = arith.constant 0 : index
    %c0_10 = arith.constant 0 : index
    %27 = vector.load %arg2[%26, %c0_9, %c0_10] : memref<100x1x128xf32, #tpu.memory_space<vmem>>, vector<1x1x128xf32>
    %28 = vector.shape_cast %27 : vector<1x1x128xf32> to vector<1x128xf32>
    %c32_i32_11 = arith.constant 32 : i32
    %29 = tpu.dynamic_rotate %28 by %c32_i32_11 dim 1 : vector<1x128xf32>, i32 -> vector<1x128xf32>
    %30 = arith.addf %24, %29 : vector<1x128xf32>
    %c5 = arith.constant 5 : index
    %31 = memref.load %arg1[%c5] : memref<44xi32, #tpu.memory_space<smem>>
    %32 = arith.index_cast %31 : i32 to index
    %c0_12 = arith.constant 0 : index
    %c0_13 = arith.constant 0 : index
    %33 = vector.load %arg2[%32, %c0_12, %c0_13] : memref<100x1x128xf32, #tpu.memory_space<vmem>>, vector<1x1x128xf32>
    %34 = vector.shape_cast %33 : vector<1x1x128xf32> to vector<1x128xf32>
    %c64_i32_14 = arith.constant 64 : i32
    %35 = tpu.dynamic_rotate %34 by %c64_i32_14 dim 1 : vector<1x128xf32>, i32 -> vector<1x128xf32>
    %36 = arith.addf %30, %35 : vector<1x128xf32>
    %c6 = arith.constant 6 : index
    %37 = memref.load %arg1[%c6] : memref<44xi32, #tpu.memory_space<smem>>
    %38 = arith.index_cast %37 : i32 to index
    %c0_15 = arith.constant 0 : index
    %c0_16 = arith.constant 0 : index
    %39 = vector.load %arg2[%38, %c0_15, %c0_16] : memref<100x1x128xf32, #tpu.memory_space<vmem>>, vector<1x1x128xf32>
    %40 = vector.shape_cast %39 : vector<1x1x128xf32> to vector<1x128xf32>
    %c96_i32_17 = arith.constant 96 : i32
    %41 = tpu.dynamic_rotate %40 by %c96_i32_17 dim 1 : vector<1x128xf32>, i32 -> vector<1x128xf32>
    %42 = arith.addf %36, %41 : vector<1x128xf32>
    %cst_18 = arith.constant 0.000000e+00 : f32
    %43 = vector.broadcast %cst_18 : f32 to vector<1x128xf32>
    %c7 = arith.constant 7 : index
    %44 = memref.load %arg1[%c7] : memref<44xi32, #tpu.memory_space<smem>>
    %45 = arith.index_cast %44 : i32 to index
    %c0_19 = arith.constant 0 : index
    %c0_20 = arith.constant 0 : index
    %46 = vector.load %arg2[%45, %c0_19, %c0_20] : memref<100x1x128xf32, #tpu.memory_space<vmem>>, vector<1x1x128xf32>
    %47 = vector.shape_cast %46 : vector<1x1x128xf32> to vector<1x128xf32>
    %48 = arith.addf %43, %47 : vector<1x128xf32>
    %c8 = arith.constant 8 : index
    %49 = memref.load %arg1[%c8] : memref<44xi32, #tpu.memory_space<smem>>
    %50 = arith.index_cast %49 : i32 to index
    %c0_21 = arith.constant 0 : index
    %c0_22 = arith.constant 0 : index
    %51 = vector.load %arg2[%50, %c0_21, %c0_22] : memref<100x1x128xf32, #tpu.memory_space<vmem>>, vector<1x1x128xf32>
    %52 = vector.shape_cast %51 : vector<1x1x128xf32> to vector<1x128xf32>
    %c32_i32_23 = arith.constant 32 : i32
    %53 = tpu.dynamic_rotate %52 by %c32_i32_23 dim 1 : vector<1x128xf32>, i32 -> vector<1x128xf32>
    %54 = arith.addf %48, %53 : vector<1x128xf32>
    %c9 = arith.constant 9 : index
    %55 = memref.load %arg1[%c9] : memref<44xi32, #tpu.memory_space<smem>>
    %56 = arith.index_cast %55 : i32 to index
    %c0_24 = arith.constant 0 : index
    %c0_25 = arith.constant 0 : index
    %57 = vector.load %arg2[%56, %c0_24, %c0_25] : memref<100x1x128xf32, #tpu.memory_space<vmem>>, vector<1x1x128xf32>
    %58 = vector.shape_cast %57 : vector<1x1x128xf32> to vector<1x128xf32>
    %c64_i32_26 = arith.constant 64 : i32
    %59 = tpu.dynamic_rotate %58 by %c64_i32_26 dim 1 : vector<1x128xf32>, i32 -> vector<1x128xf32>
    %60 = arith.addf %54, %59 : vector<1x128xf32>
    %c10 = arith.constant 10 : index
    %61 = memref.load %arg1[%c10] : memref<44xi32, #tpu.memory_space<smem>>
    %62 = arith.index_cast %61 : i32 to index
    %c0_27 = arith.constant 0 : index
    %c0_28 = arith.constant 0 : index
    %63 = vector.load %arg2[%62, %c0_27, %c0_28] : memref<100x1x128xf32, #tpu.memory_space<vmem>>, vector<1x1x128xf32>
    %64 = vector.shape_cast %63 : vector<1x1x128xf32> to vector<1x128xf32>
    %c96_i32_29 = arith.constant 96 : i32
    %65 = tpu.dynamic_rotate %64 by %c96_i32_29 dim 1 : vector<1x128xf32>, i32 -> vector<1x128xf32>
    %66 = arith.addf %60, %65 : vector<1x128xf32>
    %cst_30 = arith.constant 0.000000e+00 : f32
    %67 = vector.broadcast %cst_30 : f32 to vector<1x128xf32>
    %c11 = arith.constant 11 : index
    %68 = memref.load %arg1[%c11] : memref<44xi32, #tpu.memory_space<smem>>
    %69 = arith.index_cast %68 : i32 to index
    %c0_31 = arith.constant 0 : index
    %c0_32 = arith.constant 0 : index
    %70 = vector.load %arg2[%69, %c0_31, %c0_32] : memref<100x1x128xf32, #tpu.memory_space<vmem>>, vector<1x1x128xf32>
    %71 = vector.shape_cast %70 : vector<1x1x128xf32> to vector<1x128xf32>
    %72 = arith.addf %67, %71 : vector<1x128xf32>
    %c12 = arith.constant 12 : index
    %73 = memref.load %arg1[%c12] : memref<44xi32, #tpu.memory_space<smem>>
    %74 = arith.index_cast %73 : i32 to index
    %c0_33 = arith.constant 0 : index
    %c0_34 = arith.constant 0 : index
    %75 = vector.load %arg2[%74, %c0_33, %c0_34] : memref<100x1x128xf32, #tpu.memory_space<vmem>>, vector<1x1x128xf32>
    %76 = vector.shape_cast %75 : vector<1x1x128xf32> to vector<1x128xf32>
    %c32_i32_35 = arith.constant 32 : i32
    %77 = tpu.dynamic_rotate %76 by %c32_i32_35 dim 1 : vector<1x128xf32>, i32 -> vector<1x128xf32>
    %78 = arith.addf %72, %77 : vector<1x128xf32>
    %c13 = arith.constant 13 : index
    %79 = memref.load %arg1[%c13] : memref<44xi32, #tpu.memory_space<smem>>
    %80 = arith.index_cast %79 : i32 to index
    %c0_36 = arith.constant 0 : index
    %c0_37 = arith.constant 0 : index
    %81 = vector.load %arg2[%80, %c0_36, %c0_37] : memref<100x1x128xf32, #tpu.memory_space<vmem>>, vector<1x1x128xf32>
    %82 = vector.shape_cast %81 : vector<1x1x128xf32> to vector<1x128xf32>
    %c64_i32_38 = arith.constant 64 : i32
    %83 = tpu.dynamic_rotate %82 by %c64_i32_38 dim 1 : vector<1x128xf32>, i32 -> vector<1x128xf32>
    %84 = arith.addf %78, %83 : vector<1x128xf32>
    %c14 = arith.constant 14 : index
    %85 = memref.load %arg1[%c14] : memref<44xi32, #tpu.memory_space<smem>>
    %86 = arith.index_cast %85 : i32 to index
    %c0_39 = arith.constant 0 : index
    %c0_40 = arith.constant 0 : index
    %87 = vector.load %arg2[%86, %c0_39, %c0_40] : memref<100x1x128xf32, #tpu.memory_space<vmem>>, vector<1x1x128xf32>
    %88 = vector.shape_cast %87 : vector<1x1x128xf32> to vector<1x128xf32>
    %c96_i32_41 = arith.constant 96 : i32
    %89 = tpu.dynamic_rotate %88 by %c96_i32_41 dim 1 : vector<1x128xf32>, i32 -> vector<1x128xf32>
    %90 = arith.addf %84, %89 : vector<1x128xf32>
    %cst_42 = arith.constant 0.000000e+00 : f32
    %91 = vector.broadcast %cst_42 : f32 to vector<1x128xf32>
    %c15 = arith.constant 15 : index
    %92 = memref.load %arg1[%c15] : memref<44xi32, #tpu.memory_space<smem>>
    %93 = arith.index_cast %92 : i32 to index
    %c0_43 = arith.constant 0 : index
    %c0_44 = arith.constant 0 : index
    %94 = vector.load %arg2[%93, %c0_43, %c0_44] : memref<100x1x128xf32, #tpu.memory_space<vmem>>, vector<1x1x128xf32>
    %95 = vector.shape_cast %94 : vector<1x1x128xf32> to vector<1x128xf32>
    %96 = arith.addf %91, %95 : vector<1x128xf32>
    %c16 = arith.constant 16 : index
    %97 = memref.load %arg1[%c16] : memref<44xi32, #tpu.memory_space<smem>>
    %98 = arith.index_cast %97 : i32 to index
    %c0_45 = arith.constant 0 : index
    %c0_46 = arith.constant 0 : index
    %99 = vector.load %arg2[%98, %c0_45, %c0_46] : memref<100x1x128xf32, #tpu.memory_space<vmem>>, vector<1x1x128xf32>
    %100 = vector.shape_cast %99 : vector<1x1x128xf32> to vector<1x128xf32>
    %c32_i32_47 = arith.constant 32 : i32
    %101 = tpu.dynamic_rotate %100 by %c32_i32_47 dim 1 : vector<1x128xf32>, i32 -> vector<1x128xf32>
    %102 = arith.addf %96, %101 : vector<1x128xf32>
    %c17 = arith.constant 17 : index
    %103 = memref.load %arg1[%c17] : memref<44xi32, #tpu.memory_space<smem>>
    %104 = arith.index_cast %103 : i32 to index
    %c0_48 = arith.constant 0 : index
    %c0_49 = arith.constant 0 : index
    %105 = vector.load %arg2[%104, %c0_48, %c0_49] : memref<100x1x128xf32, #tpu.memory_space<vmem>>, vector<1x1x128xf32>
    %106 = vector.shape_cast %105 : vector<1x1x128xf32> to vector<1x128xf32>
    %c64_i32_50 = arith.constant 64 : i32
    %107 = tpu.dynamic_rotate %106 by %c64_i32_50 dim 1 : vector<1x128xf32>, i32 -> vector<1x128xf32>
    %108 = arith.addf %102, %107 : vector<1x128xf32>
    %c18 = arith.constant 18 : index
    %109 = memref.load %arg1[%c18] : memref<44xi32, #tpu.memory_space<smem>>
    %110 = arith.index_cast %109 : i32 to index
    %c0_51 = arith.constant 0 : index
    %c0_52 = arith.constant 0 : index
    %111 = vector.load %arg2[%110, %c0_51, %c0_52] : memref<100x1x128xf32, #tpu.memory_space<vmem>>, vector<1x1x128xf32>
    %112 = vector.shape_cast %111 : vector<1x1x128xf32> to vector<1x128xf32>
    %c96_i32_53 = arith.constant 96 : i32
    %113 = tpu.dynamic_rotate %112 by %c96_i32_53 dim 1 : vector<1x128xf32>, i32 -> vector<1x128xf32>
    %114 = arith.addf %108, %113 : vector<1x128xf32>
    %cst_54 = arith.constant 0.000000e+00 : f32
    %115 = vector.broadcast %cst_54 : f32 to vector<1x128xf32>
    %c19 = arith.constant 19 : index
    %116 = memref.load %arg1[%c19] : memref<44xi32, #tpu.memory_space<smem>>
    %117 = arith.index_cast %116 : i32 to index
    %c0_55 = arith.constant 0 : index
    %c0_56 = arith.constant 0 : index
    %118 = vector.load %arg2[%117, %c0_55, %c0_56] : memref<100x1x128xf32, #tpu.memory_space<vmem>>, vector<1x1x128xf32>
    %119 = vector.shape_cast %118 : vector<1x1x128xf32> to vector<1x128xf32>
    %120 = arith.addf %115, %119 : vector<1x128xf32>
    %c20 = arith.constant 20 : index
    %121 = memref.load %arg1[%c20] : memref<44xi32, #tpu.memory_space<smem>>
    %122 = arith.index_cast %121 : i32 to index
    %c0_57 = arith.constant 0 : index
    %c0_58 = arith.constant 0 : index
    %123 = vector.load %arg2[%122, %c0_57, %c0_58] : memref<100x1x128xf32, #tpu.memory_space<vmem>>, vector<1x1x128xf32>
    %124 = vector.shape_cast %123 : vector<1x1x128xf32> to vector<1x128xf32>
    %c32_i32_59 = arith.constant 32 : i32
    %125 = tpu.dynamic_rotate %124 by %c32_i32_59 dim 1 : vector<1x128xf32>, i32 -> vector<1x128xf32>
    %126 = arith.addf %120, %125 : vector<1x128xf32>
    %c21 = arith.constant 21 : index
    %127 = memref.load %arg1[%c21] : memref<44xi32, #tpu.memory_space<smem>>
    %128 = arith.index_cast %127 : i32 to index
    %c0_60 = arith.constant 0 : index
    %c0_61 = arith.constant 0 : index
    %129 = vector.load %arg2[%128, %c0_60, %c0_61] : memref<100x1x128xf32, #tpu.memory_space<vmem>>, vector<1x1x128xf32>
    %130 = vector.shape_cast %129 : vector<1x1x128xf32> to vector<1x128xf32>
    %c64_i32_62 = arith.constant 64 : i32
    %131 = tpu.dynamic_rotate %130 by %c64_i32_62 dim 1 : vector<1x128xf32>, i32 -> vector<1x128xf32>
    %132 = arith.addf %126, %131 : vector<1x128xf32>
    %133 = tpu.concatenate %18, %42, %66, %90, %114, %132 in 1 : vector<1x128xf32>, vector<1x128xf32>, vector<1x128xf32>, vector<1x128xf32>, vector<1x128xf32>, vector<1x128xf32> -> vector<1x768xf32>
    %cst_63 = arith.constant 0.000000e+00 : f32
    %134 = vector.broadcast %cst_63 : f32 to vector<1x128xf32>
    %c22 = arith.constant 22 : index
    %135 = memref.load %arg1[%c22] : memref<44xi32, #tpu.memory_space<smem>>
    %136 = arith.index_cast %135 : i32 to index
    %c0_64 = arith.constant 0 : index
    %c0_65 = arith.constant 0 : index
    %137 = vector.load %arg2[%136, %c0_64, %c0_65] : memref<100x1x128xf32, #tpu.memory_space<vmem>>, vector<1x1x128xf32>
    %138 = vector.shape_cast %137 : vector<1x1x128xf32> to vector<1x128xf32>
    %c32_i32_66 = arith.constant 32 : i32
    %139 = tpu.dynamic_rotate %138 by %c32_i32_66 dim 1 : vector<1x128xf32>, i32 -> vector<1x128xf32>
    %140 = arith.addf %134, %139 : vector<1x128xf32>
    %c23 = arith.constant 23 : index
    %141 = memref.load %arg1[%c23] : memref<44xi32, #tpu.memory_space<smem>>
    %142 = arith.index_cast %141 : i32 to index
    %c0_67 = arith.constant 0 : index
    %c0_68 = arith.constant 0 : index
    %143 = vector.load %arg2[%142, %c0_67, %c0_68] : memref<100x1x128xf32, #tpu.memory_space<vmem>>, vector<1x1x128xf32>
    %144 = vector.shape_cast %143 : vector<1x1x128xf32> to vector<1x128xf32>
    %c64_i32_69 = arith.constant 64 : i32
    %145 = tpu.dynamic_rotate %144 by %c64_i32_69 dim 1 : vector<1x128xf32>, i32 -> vector<1x128xf32>
    %146 = arith.addf %140, %145 : vector<1x128xf32>
    %c24 = arith.constant 24 : index
    %147 = memref.load %arg1[%c24] : memref<44xi32, #tpu.memory_space<smem>>
    %148 = arith.index_cast %147 : i32 to index
    %c0_70 = arith.constant 0 : index
    %c0_71 = arith.constant 0 : index
    %149 = vector.load %arg2[%148, %c0_70, %c0_71] : memref<100x1x128xf32, #tpu.memory_space<vmem>>, vector<1x1x128xf32>
    %150 = vector.shape_cast %149 : vector<1x1x128xf32> to vector<1x128xf32>
    %c96_i32_72 = arith.constant 96 : i32
    %151 = tpu.dynamic_rotate %150 by %c96_i32_72 dim 1 : vector<1x128xf32>, i32 -> vector<1x128xf32>
    %152 = arith.addf %146, %151 : vector<1x128xf32>
    %cst_73 = arith.constant 0.000000e+00 : f32
    %153 = vector.broadcast %cst_73 : f32 to vector<1x128xf32>
    %c25 = arith.constant 25 : index
    %154 = memref.load %arg1[%c25] : memref<44xi32, #tpu.memory_space<smem>>
    %155 = arith.index_cast %154 : i32 to index
    %c0_74 = arith.constant 0 : index
    %c0_75 = arith.constant 0 : index
    %156 = vector.load %arg2[%155, %c0_74, %c0_75] : memref<100x1x128xf32, #tpu.memory_space<vmem>>, vector<1x1x128xf32>
    %157 = vector.shape_cast %156 : vector<1x1x128xf32> to vector<1x128xf32>
    %158 = arith.addf %153, %157 : vector<1x128xf32>
    %c26 = arith.constant 26 : index
    %159 = memref.load %arg1[%c26] : memref<44xi32, #tpu.memory_space<smem>>
    %160 = arith.index_cast %159 : i32 to index
    %c0_76 = arith.constant 0 : index
    %c0_77 = arith.constant 0 : index
    %161 = vector.load %arg2[%160, %c0_76, %c0_77] : memref<100x1x128xf32, #tpu.memory_space<vmem>>, vector<1x1x128xf32>
    %162 = vector.shape_cast %161 : vector<1x1x128xf32> to vector<1x128xf32>
    %c32_i32_78 = arith.constant 32 : i32
    %163 = tpu.dynamic_rotate %162 by %c32_i32_78 dim 1 : vector<1x128xf32>, i32 -> vector<1x128xf32>
    %164 = arith.addf %158, %163 : vector<1x128xf32>
    %c27 = arith.constant 27 : index
    %165 = memref.load %arg1[%c27] : memref<44xi32, #tpu.memory_space<smem>>
    %166 = arith.index_cast %165 : i32 to index
    %c0_79 = arith.constant 0 : index
    %c0_80 = arith.constant 0 : index
    %167 = vector.load %arg2[%166, %c0_79, %c0_80] : memref<100x1x128xf32, #tpu.memory_space<vmem>>, vector<1x1x128xf32>
    %168 = vector.shape_cast %167 : vector<1x1x128xf32> to vector<1x128xf32>
    %c64_i32_81 = arith.constant 64 : i32
    %169 = tpu.dynamic_rotate %168 by %c64_i32_81 dim 1 : vector<1x128xf32>, i32 -> vector<1x128xf32>
    %170 = arith.addf %164, %169 : vector<1x128xf32>
    %c28 = arith.constant 28 : index
    %171 = memref.load %arg1[%c28] : memref<44xi32, #tpu.memory_space<smem>>
    %172 = arith.index_cast %171 : i32 to index
    %c0_82 = arith.constant 0 : index
    %c0_83 = arith.constant 0 : index
    %173 = vector.load %arg2[%172, %c0_82, %c0_83] : memref<100x1x128xf32, #tpu.memory_space<vmem>>, vector<1x1x128xf32>
    %174 = vector.shape_cast %173 : vector<1x1x128xf32> to vector<1x128xf32>
    %c96_i32_84 = arith.constant 96 : i32
    %175 = tpu.dynamic_rotate %174 by %c96_i32_84 dim 1 : vector<1x128xf32>, i32 -> vector<1x128xf32>
    %176 = arith.addf %170, %175 : vector<1x128xf32>
    %cst_85 = arith.constant 0.000000e+00 : f32
    %177 = vector.broadcast %cst_85 : f32 to vector<1x128xf32>
    %c29 = arith.constant 29 : index
    %178 = memref.load %arg1[%c29] : memref<44xi32, #tpu.memory_space<smem>>
    %179 = arith.index_cast %178 : i32 to index
    %c0_86 = arith.constant 0 : index
    %c0_87 = arith.constant 0 : index
    %180 = vector.load %arg2[%179, %c0_86, %c0_87] : memref<100x1x128xf32, #tpu.memory_space<vmem>>, vector<1x1x128xf32>
    %181 = vector.shape_cast %180 : vector<1x1x128xf32> to vector<1x128xf32>
    %182 = arith.addf %177, %181 : vector<1x128xf32>
    %c30 = arith.constant 30 : index
    %183 = memref.load %arg1[%c30] : memref<44xi32, #tpu.memory_space<smem>>
    %184 = arith.index_cast %183 : i32 to index
    %c0_88 = arith.constant 0 : index
    %c0_89 = arith.constant 0 : index
    %185 = vector.load %arg2[%184, %c0_88, %c0_89] : memref<100x1x128xf32, #tpu.memory_space<vmem>>, vector<1x1x128xf32>
    %186 = vector.shape_cast %185 : vector<1x1x128xf32> to vector<1x128xf32>
    %c32_i32_90 = arith.constant 32 : i32
    %187 = tpu.dynamic_rotate %186 by %c32_i32_90 dim 1 : vector<1x128xf32>, i32 -> vector<1x128xf32>
    %188 = arith.addf %182, %187 : vector<1x128xf32>
    %c31 = arith.constant 31 : index
    %189 = memref.load %arg1[%c31] : memref<44xi32, #tpu.memory_space<smem>>
    %190 = arith.index_cast %189 : i32 to index
    %c0_91 = arith.constant 0 : index
    %c0_92 = arith.constant 0 : index
    %191 = vector.load %arg2[%190, %c0_91, %c0_92] : memref<100x1x128xf32, #tpu.memory_space<vmem>>, vector<1x1x128xf32>
    %192 = vector.shape_cast %191 : vector<1x1x128xf32> to vector<1x128xf32>
    %c64_i32_93 = arith.constant 64 : i32
    %193 = tpu.dynamic_rotate %192 by %c64_i32_93 dim 1 : vector<1x128xf32>, i32 -> vector<1x128xf32>
    %194 = arith.addf %188, %193 : vector<1x128xf32>
    %c32 = arith.constant 32 : index
    %195 = memref.load %arg1[%c32] : memref<44xi32, #tpu.memory_space<smem>>
    %196 = arith.index_cast %195 : i32 to index
    %c0_94 = arith.constant 0 : index
    %c0_95 = arith.constant 0 : index
    %197 = vector.load %arg2[%196, %c0_94, %c0_95] : memref<100x1x128xf32, #tpu.memory_space<vmem>>, vector<1x1x128xf32>
    %198 = vector.shape_cast %197 : vector<1x1x128xf32> to vector<1x128xf32>
    %c96_i32_96 = arith.constant 96 : i32
    %199 = tpu.dynamic_rotate %198 by %c96_i32_96 dim 1 : vector<1x128xf32>, i32 -> vector<1x128xf32>
    %200 = arith.addf %194, %199 : vector<1x128xf32>
    %cst_97 = arith.constant 0.000000e+00 : f32
    %201 = vector.broadcast %cst_97 : f32 to vector<1x128xf32>
    %c33 = arith.constant 33 : index
    %202 = memref.load %arg1[%c33] : memref<44xi32, #tpu.memory_space<smem>>
    %203 = arith.index_cast %202 : i32 to index
    %c0_98 = arith.constant 0 : index
    %c0_99 = arith.constant 0 : index
    %204 = vector.load %arg2[%203, %c0_98, %c0_99] : memref<100x1x128xf32, #tpu.memory_space<vmem>>, vector<1x1x128xf32>
    %205 = vector.shape_cast %204 : vector<1x1x128xf32> to vector<1x128xf32>
    %206 = arith.addf %201, %205 : vector<1x128xf32>
    %c34 = arith.constant 34 : index
    %207 = memref.load %arg1[%c34] : memref<44xi32, #tpu.memory_space<smem>>
    %208 = arith.index_cast %207 : i32 to index
    %c0_100 = arith.constant 0 : index
    %c0_101 = arith.constant 0 : index
    %209 = vector.load %arg2[%208, %c0_100, %c0_101] : memref<100x1x128xf32, #tpu.memory_space<vmem>>, vector<1x1x128xf32>
    %210 = vector.shape_cast %209 : vector<1x1x128xf32> to vector<1x128xf32>
    %c32_i32_102 = arith.constant 32 : i32
    %211 = tpu.dynamic_rotate %210 by %c32_i32_102 dim 1 : vector<1x128xf32>, i32 -> vector<1x128xf32>
    %212 = arith.addf %206, %211 : vector<1x128xf32>
    %c35 = arith.constant 35 : index
    %213 = memref.load %arg1[%c35] : memref<44xi32, #tpu.memory_space<smem>>
    %214 = arith.index_cast %213 : i32 to index
    %c0_103 = arith.constant 0 : index
    %c0_104 = arith.constant 0 : index
    %215 = vector.load %arg2[%214, %c0_103, %c0_104] : memref<100x1x128xf32, #tpu.memory_space<vmem>>, vector<1x1x128xf32>
    %216 = vector.shape_cast %215 : vector<1x1x128xf32> to vector<1x128xf32>
    %c64_i32_105 = arith.constant 64 : i32
    %217 = tpu.dynamic_rotate %216 by %c64_i32_105 dim 1 : vector<1x128xf32>, i32 -> vector<1x128xf32>
    %218 = arith.addf %212, %217 : vector<1x128xf32>
    %c36 = arith.constant 36 : index
    %219 = memref.load %arg1[%c36] : memref<44xi32, #tpu.memory_space<smem>>
    %220 = arith.index_cast %219 : i32 to index
    %c0_106 = arith.constant 0 : index
    %c0_107 = arith.constant 0 : index
    %221 = vector.load %arg2[%220, %c0_106, %c0_107] : memref<100x1x128xf32, #tpu.memory_space<vmem>>, vector<1x1x128xf32>
    %222 = vector.shape_cast %221 : vector<1x1x128xf32> to vector<1x128xf32>
    %c96_i32_108 = arith.constant 96 : i32
    %223 = tpu.dynamic_rotate %222 by %c96_i32_108 dim 1 : vector<1x128xf32>, i32 -> vector<1x128xf32>
    %224 = arith.addf %218, %223 : vector<1x128xf32>
    %cst_109 = arith.constant 0.000000e+00 : f32
    %225 = vector.broadcast %cst_109 : f32 to vector<1x128xf32>
    %c37 = arith.constant 37 : index
    %226 = memref.load %arg1[%c37] : memref<44xi32, #tpu.memory_space<smem>>
    %227 = arith.index_cast %226 : i32 to index
    %c0_110 = arith.constant 0 : index
    %c0_111 = arith.constant 0 : index
    %228 = vector.load %arg2[%227, %c0_110, %c0_111] : memref<100x1x128xf32, #tpu.memory_space<vmem>>, vector<1x1x128xf32>
    %229 = vector.shape_cast %228 : vector<1x1x128xf32> to vector<1x128xf32>
    %230 = arith.addf %225, %229 : vector<1x128xf32>
    %c38 = arith.constant 38 : index
    %231 = memref.load %arg1[%c38] : memref<44xi32, #tpu.memory_space<smem>>
    %232 = arith.index_cast %231 : i32 to index
    %c0_112 = arith.constant 0 : index
    %c0_113 = arith.constant 0 : index
    %233 = vector.load %arg2[%232, %c0_112, %c0_113] : memref<100x1x128xf32, #tpu.memory_space<vmem>>, vector<1x1x128xf32>
    %234 = vector.shape_cast %233 : vector<1x1x128xf32> to vector<1x128xf32>
    %c32_i32_114 = arith.constant 32 : i32
    %235 = tpu.dynamic_rotate %234 by %c32_i32_114 dim 1 : vector<1x128xf32>, i32 -> vector<1x128xf32>
    %236 = arith.addf %230, %235 : vector<1x128xf32>
    %c39 = arith.constant 39 : index
    %237 = memref.load %arg1[%c39] : memref<44xi32, #tpu.memory_space<smem>>
    %238 = arith.index_cast %237 : i32 to index
    %c0_115 = arith.constant 0 : index
    %c0_116 = arith.constant 0 : index
    %239 = vector.load %arg2[%238, %c0_115, %c0_116] : memref<100x1x128xf32, #tpu.memory_space<vmem>>, vector<1x1x128xf32>
    %240 = vector.shape_cast %239 : vector<1x1x128xf32> to vector<1x128xf32>
    %c64_i32_117 = arith.constant 64 : i32
    %241 = tpu.dynamic_rotate %240 by %c64_i32_117 dim 1 : vector<1x128xf32>, i32 -> vector<1x128xf32>
    %242 = arith.addf %236, %241 : vector<1x128xf32>
    %c40 = arith.constant 40 : index
    %243 = memref.load %arg1[%c40] : memref<44xi32, #tpu.memory_space<smem>>
    %244 = arith.index_cast %243 : i32 to index
    %c0_118 = arith.constant 0 : index
    %c0_119 = arith.constant 0 : index
    %245 = vector.load %arg2[%244, %c0_118, %c0_119] : memref<100x1x128xf32, #tpu.memory_space<vmem>>, vector<1x1x128xf32>
    %246 = vector.shape_cast %245 : vector<1x1x128xf32> to vector<1x128xf32>
    %c96_i32_120 = arith.constant 96 : i32
    %247 = tpu.dynamic_rotate %246 by %c96_i32_120 dim 1 : vector<1x128xf32>, i32 -> vector<1x128xf32>
    %248 = arith.addf %242, %247 : vector<1x128xf32>
    %cst_121 = arith.constant 0.000000e+00 : f32
    %249 = vector.broadcast %cst_121 : f32 to vector<1x128xf32>
    %c41 = arith.constant 41 : index
    %250 = memref.load %arg1[%c41] : memref<44xi32, #tpu.memory_space<smem>>
    %251 = arith.index_cast %250 : i32 to index
    %c0_122 = arith.constant 0 : index
    %c0_123 = arith.constant 0 : index
    %252 = vector.load %arg2[%251, %c0_122, %c0_123] : memref<100x1x128xf32, #tpu.memory_space<vmem>>, vector<1x1x128xf32>
    %253 = vector.shape_cast %252 : vector<1x1x128xf32> to vector<1x128xf32>
    %254 = arith.addf %249, %253 : vector<1x128xf32>
    %c42 = arith.constant 42 : index
    %255 = memref.load %arg1[%c42] : memref<44xi32, #tpu.memory_space<smem>>
    %256 = arith.index_cast %255 : i32 to index
    %c0_124 = arith.constant 0 : index
    %c0_125 = arith.constant 0 : index
    %257 = vector.load %arg2[%256, %c0_124, %c0_125] : memref<100x1x128xf32, #tpu.memory_space<vmem>>, vector<1x1x128xf32>
    %258 = vector.shape_cast %257 : vector<1x1x128xf32> to vector<1x128xf32>
    %c32_i32_126 = arith.constant 32 : i32
    %259 = tpu.dynamic_rotate %258 by %c32_i32_126 dim 1 : vector<1x128xf32>, i32 -> vector<1x128xf32>
    %260 = arith.addf %254, %259 : vector<1x128xf32>
    %c43 = arith.constant 43 : index
    %261 = memref.load %arg1[%c43] : memref<44xi32, #tpu.memory_space<smem>>
    %262 = arith.index_cast %261 : i32 to index
    %c0_127 = arith.constant 0 : index
    %c0_128 = arith.constant 0 : index
    %263 = vector.load %arg2[%262, %c0_127, %c0_128] : memref<100x1x128xf32, #tpu.memory_space<vmem>>, vector<1x1x128xf32>
    %264 = vector.shape_cast %263 : vector<1x1x128xf32> to vector<1x128xf32>
    %c64_i32_129 = arith.constant 64 : i32
    %265 = tpu.dynamic_rotate %264 by %c64_i32_129 dim 1 : vector<1x128xf32>, i32 -> vector<1x128xf32>
    %266 = arith.addf %260, %265 : vector<1x128xf32>
    %267 = tpu.concatenate %152, %176, %200, %224, %248, %266 in 1 : vector<1x128xf32>, vector<1x128xf32>, vector<1x128xf32>, vector<1x128xf32>, vector<1x128xf32>, vector<1x128xf32> -> vector<1x768xf32>
    %268 = tpu.concatenate %133, %267 in 0 : vector<1x768xf32>, vector<1x768xf32> -> vector<2x768xf32>
    %269 = arith.truncf %268 : vector<2x768xf32> to vector<2x768xbf16>
    tpu.wait_dma2 semaphore(%arg9 : memref<!tpu.dma_semaphore, #tpu.memory_space<semaphore_mem>>) src(%arg3 : memref<768x352xbf16, #tpu.memory_space<any>>) dst(%arg8 : memref<768x352xbf16, #tpu.memory_space<vmem>>)
    %c0_130 = arith.constant 0 : index
    %c0_131 = arith.constant 0 : index
    %270 = vector.load %arg8[%c0_130, %c0_131] : memref<768x352xbf16, #tpu.memory_space<vmem>>, vector<768x352xbf16>
    %cst_132 = arith.constant dense<0.000000e+00> : vector<2x352xf32>
    %271 = tpu.matmul %269, %270, %cst_132 {dimension_numbers = #tpu.dot_dimension_numbers<[1], [0], [0], [1], [0, 0, 1, 1], [], []>} : vector<2x768xbf16>, vector<768x352xbf16>, vector<2x352xf32> -> vector<2x352xf32>
    %c0_133 = arith.constant 0 : index
    %c0_134 = arith.constant 0 : index
    %272 = vector.load %arg4[%c0_133, %c0_134] : memref<1x352xf32, #tpu.memory_space<vmem>>, vector<1x352xf32>
    %273 = vector.broadcast %272 : vector<1x352xf32> to vector<2x352xf32>
    %274 = arith.addf %271, %273 : vector<2x352xf32>
    %cst_135 = arith.constant 0.000000e+00 : f32
    %275 = vector.broadcast %cst_135 : f32 to vector<2x352xf32>
    %276 = arith.maximumf %274, %275 : vector<2x352xf32>
    %277 = arith.truncf %276 : vector<2x352xf32> to vector<2x352xbf16>
    %c0_136 = arith.constant 0 : index
    %c0_137 = arith.constant 0 : index
    %278 = vector.load %arg5[%c0_136, %c0_137] : memref<352x8xbf16, #tpu.memory_space<vmem>>, vector<352x8xbf16>
    %cst_138 = arith.constant dense<0.000000e+00> : vector<2x8xf32>
    %279 = tpu.matmul %277, %278, %cst_138 {dimension_numbers = #tpu.dot_dimension_numbers<[1], [0], [0], [1], [0, 0, 1, 1], [], []>} : vector<2x352xbf16>, vector<352x8xbf16>, vector<2x8xf32> -> vector<2x8xf32>
    %c0_139 = arith.constant 0 : index
    %c0_140 = arith.constant 0 : index
    %280 = vector.load %arg6[%c0_139, %c0_140] : memref<1x8xf32, #tpu.memory_space<vmem>>, vector<1x8xf32>
    %281 = vector.broadcast %280 : vector<1x8xf32> to vector<2x8xf32>
    %282 = arith.addf %279, %281 : vector<2x8xf32>
    %c0_141 = arith.constant 0 : index
    %c0_142 = arith.constant 0 : index
    %283 = vector.load %arg7[%c0_141, %c0_142] : memref<2x8xf32, #tpu.memory_space<vmem>>, vector<2x8xf32>
    tpu.vector_store %arg7[%c0_141, %c0_142], %282 {strides = array<i32>} : memref<2x8xf32, #tpu.memory_space<vmem>>, vector<2x8xf32>,
    return
  }
  func.func @transform_0(%arg0: i32, %arg1: memref<44xi32, #tpu.memory_space<smem>>) -> (i32, i32, i32) {
    %c0_i32 = arith.constant 0 : i32
    %c0_i32_0 = arith.constant 0 : i32
    %c0_i32_1 = arith.constant 0 : i32
    %c0_i32_2 = arith.constant 0 : i32
    return %c0_i32, %c0_i32_0, %c0_i32_1 : i32, i32, i32
  }
  func.func @transform_2(%arg0: i32, %arg1: memref<44xi32, #tpu.memory_space<smem>>) -> (i32, i32) {
    %c0_i32 = arith.constant 0 : i32
    %c0_i32_0 = arith.constant 0 : i32
    %c0_i32_1 = arith.constant 0 : i32
    return %c0_i32, %c0_i32_0 : i32, i32
  }
  func.func @transform_3(%arg0: i32, %arg1: memref<44xi32, #tpu.memory_space<smem>>) -> (i32, i32) {
    %c0_i32 = arith.constant 0 : i32
    %c0_i32_0 = arith.constant 0 : i32
    %c0_i32_1 = arith.constant 0 : i32
    return %c0_i32, %c0_i32_0 : i32, i32
  }
  func.func @transform_4(%arg0: i32, %arg1: memref<44xi32, #tpu.memory_space<smem>>) -> (i32, i32) {
    %c0_i32 = arith.constant 0 : i32
    %c0_i32_0 = arith.constant 0 : i32
    %c0_i32_1 = arith.constant 0 : i32
    return %c0_i32, %c0_i32_0 : i32, i32
  }
  func.func @transform_5(%arg0: i32, %arg1: memref<44xi32, #tpu.memory_space<smem>>) -> (i32, i32) {
    %c0_i32 = arith.constant 0 : i32
    %c0_i32_0 = arith.constant 0 : i32
    %c0_i32_1 = arith.constant 0 : i32
    return %c0_i32, %c0_i32_0 : i32, i32
  }
}

</mosaic_0001>

<bundles_post_ra>
// kernel: _charmodel_pallas.1
= control target key start
LH: loop header
LB: loop body
LE: loop exit
PB: predicated region body
PF: predicated region fallthrough
CT: control target
= control target key end

     0   :  { %s3607_s0 = inlined_call_operand.vmem [shape: s32[44], index: 0, kind: input, shape index: {}]   ;;  %s3608_s1 = inlined_call_operand.vmem [shape: f32[100,1,128], index: 1, kind: input, shape index: {}]   ;;  %s3609_s2 = inlined_call_operand.vmem [shape: bf16[768,352], index: 2, kind: input, shape index: {}]   ;;  %s3610_s3 = inlined_call_operand.vmem [shape: f32[1,352], index: 3, kind: input, shape index: {}]   ;;  %s3611_s4 = inlined_call_operand.vmem [shape: bf16[352,8], index: 4, kind: input, shape index: {}]   ;;  %s3612_s5 = inlined_call_operand.vmem [shape: f32[1,8], index: 5, kind: input, shape index: {}]   ;;  %s3613_s6 = inlined_call_operand.hbm [shape: f32[2,8], index: 6, kind: output, shape index: {}]  }
   0x1   :  { %s11_s23 = sshll.u32 %s3607_s0, 4  ;;  %s12_s23 = int_to_ptr.vmem [resolvable:$true] %s11_s23 }
   0x2   :  { %s2481_s24 = scalar_lea.vmem %s12_s23, 16  ;;  %p2486_p1 = scmp.lt.s32.totalorder %s12_s23, %s12_s23 }
   0x3   :  { %p2482_p0 = scmp.ne.s32.totalorder %s12_s23, %s2481_s24  ;;  %p2487_p2 = scmp.lt.s32.totalorder %s2481_s24, %s2481_s24 }
   0x5   :  { %p2488_p3 = por %p2487_p2, %p2486_p1 }
   0x7   :  { %p2489_p4 = pnand %p2488_p3, %p2482_p0 }
   0x9   :  { %2492 = shalt.err (!%p2489_p4)  }
   0xa   :  { %s2521_s25 = smov [#allocation5]  }
   0xb   :  { %14 = dma.vmem_to_smem %s12_s23, 16, %s2521_s25, [#allocation4] }
   0xc   :  { %2515 = dma.done.wait [#allocation4], 16 }
   0xd   :  { %2516 = vsyncadd [#allocation4], 4294967280 }
   0xe   :  { %16 = sfence }
   0xf   :  { %17 = vsyncpa [#allocation7], 0  ;;  %v44_v0 = vld [vmem:[%s3609_s2] sm:$0xf]  ;;  %v46_v1 = vld [vmem:[%s3609_s2 + $0xc] sm:$0xf] }
  0x10   :  { %45 = vst [vmem:[#allocation2] sm:$0xf] %v44_v0  ;;  %47 = vst [vmem:[#allocation2 + $0x4] sm:$0xf] %v46_v1  ;;  %v48_v2 = vld [vmem:[%s3609_s2 + $0x4] sm:$0xf] }
  0x11   :  { %v50_v3 = vld [vmem:[%s3609_s2 + $0x10] sm:$0xf]  ;;  %v52_v4 = vld [vmem:[%s3609_s2 + $0x8] sm:$0xf]  ;;  %49 = vst [vmem:[#allocation2 + $0x8] sm:$0xf] %v48_v2 }
  0x12   :  { %51 = vst [vmem:[#allocation2 + $0xc] sm:$0xf] %v50_v3  ;;  %53 = vst [vmem:[#allocation2 + $0x10] sm:$0xf] %v52_v4  ;;  %v54_v5 = vld [vmem:[%s3609_s2 + $0x14] sm:$0xff]   ;;  %v66_v10 = vld [vmem:[%s3609_s2 + $0x2c] sm:$0xff]  }
  0x13   :  { %v58_v6 = vld [vmem:[%s3609_s2 + $0x24] sm:$0xf]  ;;  %v60_v7 = vld [vmem:[%s3609_s2 + $0x1c] sm:$0xf]  ;;  %55 = vst [vmem:[#allocation2 + $0x14] sm:$0xff] %v54_v5   ;;  %67 = vst [vmem:[#allocation2 + $0x2c] sm:$0xff] %v66_v10  }
  0x14   :  { %59 = vst [vmem:[#allocation2 + $0x1c] sm:$0xf] %v58_v6  ;;  %61 = vst [vmem:[#allocation2 + $0x20] sm:$0xf] %v60_v7  ;;  %v62_v8 = vld [vmem:[%s3609_s2 + $0x28] sm:$0xf] }
  0x15   :  { %v64_v9 = vld [vmem:[%s3609_s2 + $0x20] sm:$0xf]  ;;  %63 = vst [vmem:[#allocation2 + $0x24] sm:$0xf] %v62_v8  ;;  %v70_v11 = vld [vmem:[%s3609_s2 + $0x3c] sm:$0xf] }
  0x16   :  { %65 = vst [vmem:[#allocation2 + $0x28] sm:$0xf] %v64_v9  ;;  %v72_v12 = vld [vmem:[%s3609_s2 + $0x34] sm:$0xf]  ;;  %v74_v13 = vld [vmem:[%s3609_s2 + $0x40] sm:$0xf] }
  0x17   :  { %71 = vst [vmem:[#allocation2 + $0x34] sm:$0xf] %v70_v11  ;;  %73 = vst [vmem:[#allocation2 + $0x38] sm:$0xf] %v72_v12  ;;  %v76_v14 = vld [vmem:[%s3609_s2 + $0x38] sm:$0xf] }
  0x18   :  { %75 = vst [vmem:[#allocation2 + $0x3c] sm:$0xf] %v74_v13  ;;  %v78_v15 = vld [vmem:[%s3609_s2 + $0x44] sm:$0xff]   ;;  %v82_v16 = vld [vmem:[%s3609_s2 + $0x54] sm:$0xf]  ;;  %v90_v20 = vld [vmem:[%s3609_s2 + $0x5c] sm:$0xff]  }
  0x19   :  { %77 = vst [vmem:[#allocation2 + $0x40] sm:$0xf] %v76_v14  ;;  %79 = vst [vmem:[#allocation2 + $0x44] sm:$0xff] %v78_v15   ;;  %v84_v17 = vld [vmem:[%s3609_s2 + $0x4c] sm:$0xf]  ;;  %v102_v25 = vld [vmem:[%s3609_s2 + $0x74] sm:$0xff]  }
  0x1a   :  { %83 = vst [vmem:[#allocation2 + $0x4c] sm:$0xf] %v82_v16  ;;  %v86_v18 = vld [vmem:[%s3609_s2 + $0x58] sm:$0xf]  ;;  %v88_v19 = vld [vmem:[%s3609_s2 + $0x50] sm:$0xf] }
  0x1b   :  { %85 = vst [vmem:[#allocation2 + $0x50] sm:$0xf] %v84_v17  ;;  %87 = vst [vmem:[#allocation2 + $0x54] sm:$0xf] %v86_v18  ;;  %v94_v21 = vld [vmem:[%s3609_s2 + $0x6c] sm:$0xf] }
  0x1c   :  { %89 = vst [vmem:[#allocation2 + $0x58] sm:$0xf] %v88_v19  ;;  %v96_v22 = vld [vmem:[%s3609_s2 + $0x64] sm:$0xf]  ;;  %91 = vst [vmem:[#allocation2 + $0x5c] sm:$0xff] %v90_v20   ;;  %v114_v30 = vld [vmem:[%s3609_s2 + $0x8c] sm:$0xff]  }
  0x1d   :  { %95 = vst [vmem:[#allocation2 + $0x64] sm:$0xf] %v94_v21  ;;  %97 = vst [vmem:[#allocation2 + $0x68] sm:$0xf] %v96_v22  ;;  %v98_v23 = vld [vmem:[%s3609_s2 + $0x70] sm:$0xf] }
  0x1e   :  { %v100_v24 = vld [vmem:[%s3609_s2 + $0x68] sm:$0xf]  ;;  %99 = vst [vmem:[#allocation2 + $0x6c] sm:$0xf] %v98_v23  ;;  %103 = vst [vmem:[#allocation2 + $0x74] sm:$0xff] %v102_v25   ;;  %v138_v40 = vld [vmem:[%s3609_s2 + $0xbc] sm:$0xff]  }
  0x1f   :  { %101 = vst [vmem:[#allocation2 + $0x70] sm:$0xf] %v100_v24  ;;  %v106_v26 = vld [vmem:[%s3609_s2 + $0x84] sm:$0xf]  ;;  %v108_v27 = vld [vmem:[%s3609_s2 + $0x7c] sm:$0xf] }
  0x20   :  { %v110_v28 = vld [vmem:[%s3609_s2 + $0x88] sm:$0xf]  ;;  %107 = vst [vmem:[#allocation2 + $0x7c] sm:$0xf] %v106_v26  ;;  %109 = vst [vmem:[#allocation2 + $0x80] sm:$0xf] %v108_v27 }
  0x21   :  { %111 = vst [vmem:[#allocation2 + $0x84] sm:$0xf] %v110_v28  ;;  %v112_v29 = vld [vmem:[%s3609_s2 + $0x80] sm:$0xf]  ;;  %v118_v31 = vld [vmem:[%s3609_s2 + $0x9c] sm:$0xf] }
  0x22   :  { %113 = vst [vmem:[#allocation2 + $0x88] sm:$0xf] %v112_v29  ;;  %115 = vst [vmem:[#allocation2 + $0x8c] sm:$0xff] %v114_v30   ;;  %v120_v32 = vld [vmem:[%s3609_s2 + $0x94] sm:$0xf]  ;;  %v126_v35 = vld [vmem:[%s3609_s2 + $0xa4] sm:$0xff]  }
  0x23   :  { %119 = vst [vmem:[#allocation2 + $0x94] sm:$0xf] %v118_v31  ;;  %v122_v33 = vld [vmem:[%s3609_s2 + $0xa0] sm:$0xf]  ;;  %v124_v34 = vld [vmem:[%s3609_s2 + $0x98] sm:$0xf] }
  0x24   :  { %121 = vst [vmem:[#allocation2 + $0x98] sm:$0xf] %v120_v32  ;;  %123 = vst [vmem:[#allocation2 + $0x9c] sm:$0xf] %v122_v33  ;;  %v130_v36 = vld [vmem:[%s3609_s2 + $0xb4] sm:$0xf] }
  0x25   :  { %125 = vst [vmem:[#allocation2 + $0xa0] sm:$0xf] %v124_v34  ;;  %v132_v37 = vld [vmem:[%s3609_s2 + $0xac] sm:$0xf]  ;;  %127 = vst [vmem:[#allocation2 + $0xa4] sm:$0xff] %v126_v35   ;;  %v150_v45 = vld [vmem:[%s3609_s2 + $0xd4] sm:$0xff]  }
  0x26   :  { %131 = vst [vmem:[#allocation2 + $0xac] sm:$0xf] %v130_v36  ;;  %133 = vst [vmem:[#allocation2 + $0xb0] sm:$0xf] %v132_v37  ;;  %v134_v38 = vld [vmem:[%s3609_s2 + $0xb8] sm:$0xf] }
  0x27   :  { %v136_v39 = vld [vmem:[%s3609_s2 + $0xb0] sm:$0xf]  ;;  %135 = vst [vmem:[#allocation2 + $0xb4] sm:$0xf] %v134_v38  ;;  %139 = vst [vmem:[#allocation2 + $0xbc] sm:$0xff] %v138_v40   ;;  %v174_v55 = vld [vmem:[%s3609_s2 + $0x104] sm:$0xff]  }
  0x28   :  { %137 = vst [vmem:[#allocation2 + $0xb8] sm:$0xf] %v136_v39  ;;  %v142_v41 = vld [vmem:[%s3609_s2 + $0xcc] sm:$0xf]  ;;  %v144_v42 = vld [vmem:[%s3609_s2 + $0xc4] sm:$0xf] }
  0x29   :  { %v146_v43 = vld [vmem:[%s3609_s2 + $0xd0] sm:$0xf]  ;;  %143 = vst [vmem:[#allocation2 + $0xc4] sm:$0xf] %v142_v41  ;;  %145 = vst [vmem:[#allocation2 + $0xc8] sm:$0xf] %v144_v42 }
  0x2a   :  { %147 = vst [vmem:[#allocation2 + $0xcc] sm:$0xf] %v146_v43  ;;  %v148_v44 = vld [vmem:[%s3609_s2 + $0xc8] sm:$0xf]  ;;  %v154_v46 = vld [vmem:[%s3609_s2 + $0xe4] sm:$0xf] }
  0x2b   :  { %149 = vst [vmem:[#allocation2 + $0xd0] sm:$0xf] %v148_v44  ;;  %151 = vst [vmem:[#allocation2 + $0xd4] sm:$0xff] %v150_v45   ;;  %v156_v47 = vld [vmem:[%s3609_s2 + $0xdc] sm:$0xf]  ;;  %v162_v50 = vld [vmem:[%s3609_s2 + $0xec] sm:$0xff]  }
  0x2c   :  { %155 = vst [vmem:[#allocation2 + $0xdc] sm:$0xf] %v154_v46  ;;  %v158_v48 = vld [vmem:[%s3609_s2 + $0xe8] sm:$0xf]  ;;  %v160_v49 = vld [vmem:[%s3609_s2 + $0xe0] sm:$0xf] }
  0x2d   :  { %157 = vst [vmem:[#allocation2 + $0xe0] sm:$0xf] %v156_v47  ;;  %159 = vst [vmem:[#allocation2 + $0xe4] sm:$0xf] %v158_v48  ;;  %v166_v51 = vld [vmem:[%s3609_s2 + $0xfc] sm:$0xf] }
  0x2e   :  { %161 = vst [vmem:[#allocation2 + $0xe8] sm:$0xf] %v160_v49  ;;  %v168_v52 = vld [vmem:[%s3609_s2 + $0xf4] sm:$0xf]  ;;  %163 = vst [vmem:[#allocation2 + $0xec] sm:$0xff] %v162_v50   ;;  %v186_v60 = vld [vmem:[%s3609_s2 + $0x11c] sm:$0xff]  }
  0x2f   :  { %167 = vst [vmem:[#allocation2 + $0xf4] sm:$0xf] %v166_v51  ;;  %169 = vst [vmem:[#allocation2 + $0xf8] sm:$0xf] %v168_v52  ;;  %v170_v53 = vld [vmem:[%s3609_s2 + $0x100] sm:$0xf] }
  0x30   :  { %v172_v54 = vld [vmem:[%s3609_s2 + $0xf8] sm:$0xf]  ;;  %171 = vst [vmem:[#allocation2 + $0xfc] sm:$0xf] %v170_v53  ;;  %175 = vst [vmem:[#allocation2 + $0x104] sm:$0xff] %v174_v55   ;;  %v210_v6 = vld [vmem:[%s3609_s2 + $0x14c] sm:$0xff]  }
  0x31   :  { %173 = vst [vmem:[#allocation2 + $0x100] sm:$0xf] %v172_v54  ;;  %v178_v56 = vld [vmem:[%s3609_s2 + $0x114] sm:$0xf]  ;;  %v180_v57 = vld [vmem:[%s3609_s2 + $0x10c] sm:$0xf] }
  0x32   :  { %v182_v58 = vld [vmem:[%s3609_s2 + $0x118] sm:$0xf]  ;;  %179 = vst [vmem:[#allocation2 + $0x10c] sm:$0xf] %v178_v56  ;;  %181 = vst [vmem:[#allocation2 + $0x110] sm:$0xf] %v180_v57 }
  0x33   :  { %183 = vst [vmem:[#allocation2 + $0x114] sm:$0xf] %v182_v58  ;;  %v184_v59 = vld [vmem:[%s3609_s2 + $0x110] sm:$0xf]  ;;  %v190_v61 = vld [vmem:[%s3609_s2 + $0x12c] sm:$0xf] }
  0x34   :  { %185 = vst [vmem:[#allocation2 + $0x118] sm:$0xf] %v184_v59  ;;  %187 = vst [vmem:[#allocation2 + $0x11c] sm:$0xff] %v186_v60   ;;  %v192_v62 = vld [vmem:[%s3609_s2 + $0x124] sm:$0xf]  ;;  %v198_v1 = vld [vmem:[%s3609_s2 + $0x134] sm:$0xff]  }
  0x35   :  { %191 = vst [vmem:[#allocation2 + $0x124] sm:$0xf] %v190_v61  ;;  %v194_v63 = vld [vmem:[%s3609_s2 + $0x130] sm:$0xf]  ;;  %v196_v0 = vld [vmem:[%s3609_s2 + $0x128] sm:$0xf] }
  0x36   :  { %193 = vst [vmem:[#allocation2 + $0x128] sm:$0xf] %v192_v62  ;;  %195 = vst [vmem:[#allocation2 + $0x12c] sm:$0xf] %v194_v63  ;;  %v202_v2 = vld [vmem:[%s3609_s2 + $0x144] sm:$0xf] }
  0x37   :  { %197 = vst [vmem:[#allocation2 + $0x130] sm:$0xf] %v196_v0  ;;  %v204_v3 = vld [vmem:[%s3609_s2 + $0x13c] sm:$0xf]  ;;  %199 = vst [vmem:[#allocation2 + $0x134] sm:$0xff] %v198_v1   ;;  %v222_v11 = vld [vmem:[%s3609_s2 + $0x164] sm:$0xff]  }
  0x38   :  { %203 = vst [vmem:[#allocation2 + $0x13c] sm:$0xf] %v202_v2  ;;  %205 = vst [vmem:[#allocation2 + $0x140] sm:$0xf] %v204_v3  ;;  %v206_v4 = vld [vmem:[%s3609_s2 + $0x148] sm:$0xf] }
  0x39   :  { %v208_v5 = vld [vmem:[%s3609_s2 + $0x140] sm:$0xf]  ;;  %207 = vst [vmem:[#allocation2 + $0x144] sm:$0xf] %v206_v4  ;;  %211 = vst [vmem:[#allocation2 + $0x14c] sm:$0xff] %v210_v6   ;;  %v246_v21 = vld [vmem:[%s3609_s2 + $0x194] sm:$0xff]  }
  0x3a   :  { %209 = vst [vmem:[#allocation2 + $0x148] sm:$0xf] %v208_v5  ;;  %v214_v7 = vld [vmem:[%s3609_s2 + $0x15c] sm:$0xf]  ;;  %v216_v8 = vld [vmem:[%s3609_s2 + $0x154] sm:$0xf] }
  0x3b   :  { %v218_v9 = vld [vmem:[%s3609_s2 + $0x160] sm:$0xf]  ;;  %215 = vst [vmem:[#allocation2 + $0x154] sm:$0xf] %v214_v7  ;;  %217 = vst [vmem:[#allocation2 + $0x158] sm:$0xf] %v216_v8 }
  0x3c   :  { %219 = vst [vmem:[#allocation2 + $0x15c] sm:$0xf] %v218_v9  ;;  %v220_v10 = vld [vmem:[%s3609_s2 + $0x158] sm:$0xf]  ;;  %v226_v12 = vld [vmem:[%s3609_s2 + $0x174] sm:$0xf] }
  0x3d   :  { %221 = vst [vmem:[#allocation2 + $0x160] sm:$0xf] %v220_v10  ;;  %223 = vst [vmem:[#allocation2 + $0x164] sm:$0xff] %v222_v11   ;;  %v228_v13 = vld [vmem:[%s3609_s2 + $0x16c] sm:$0xf]  ;;  %v234_v16 = vld [vmem:[%s3609_s2 + $0x17c] sm:$0xff]  }
  0x3e   :  { %227 = vst [vmem:[#allocation2 + $0x16c] sm:$0xf] %v226_v12  ;;  %v230_v14 = vld [vmem:[%s3609_s2 + $0x178] sm:$0xf]  ;;  %v232_v15 = vld [vmem:[%s3609_s2 + $0x170] sm:$0xf] }
  0x3f   :  { %229 = vst [vmem:[#allocation2 + $0x170] sm:$0xf] %v228_v13  ;;  %231 = vst [vmem:[#allocation2 + $0x174] sm:$0xf] %v230_v14  ;;  %v238_v17 = vld [vmem:[%s3609_s2 + $0x18c] sm:$0xf] }
  0x40   :  { %233 = vst [vmem:[#allocation2 + $0x178] sm:$0xf] %v232_v15  ;;  %v240_v18 = vld [vmem:[%s3609_s2 + $0x184] sm:$0xf]  ;;  %235 = vst [vmem:[#allocation2 + $0x17c] sm:$0xff] %v234_v16   ;;  %v258_v26 = vld [vmem:[%s3609_s2 + $0x1ac] sm:$0xff]  }
  0x41   :  { %239 = vst [vmem:[#allocation2 + $0x184] sm:$0xf] %v238_v17  ;;  %241 = vst [vmem:[#allocation2 + $0x188] sm:$0xf] %v240_v18  ;;  %v242_v19 = vld [vmem:[%s3609_s2 + $0x190] sm:$0xf] }
  0x42   :  { %v244_v20 = vld [vmem:[%s3609_s2 + $0x188] sm:$0xf]  ;;  %243 = vst [vmem:[#allocation2 + $0x18c] sm:$0xf] %v242_v19  ;;  %247 = vst [vmem:[#allocation2 + $0x194] sm:$0xff] %v246_v21   ;;  %v282_v36 = vld [vmem:[%s3609_s2 + $0x1dc] sm:$0xff]  }
  0x43   :  { %245 = vst [vmem:[#allocation2 + $0x190] sm:$0xf] %v244_v20  ;;  %v250_v22 = vld [vmem:[%s3609_s2 + $0x1a4] sm:$0xf]  ;;  %v252_v23 = vld [vmem:[%s3609_s2 + $0x19c] sm:$0xf] }
  0x44   :  { %v254_v24 = vld [vmem:[%s3609_s2 + $0x1a8] sm:$0xf]  ;;  %251 = vst [vmem:[#allocation2 + $0x19c] sm:$0xf] %v250_v22  ;;  %253 = vst [vmem:[#allocation2 + $0x1a0] sm:$0xf] %v252_v23 }
  0x45   :  { %255 = vst [vmem:[#allocation2 + $0x1a4] sm:$0xf] %v254_v24  ;;  %v256_v25 = vld [vmem:[%s3609_s2 + $0x1a0] sm:$0xf]  ;;  %v262_v27 = vld [vmem:[%s3609_s2 + $0x1bc] sm:$0xf] }
  0x46   :  { %257 = vst [vmem:[#allocation2 + $0x1a8] sm:$0xf] %v256_v25  ;;  %259 = vst [vmem:[#allocation2 + $0x1ac] sm:$0xff] %v258_v26   ;;  %v264_v28 = vld [vmem:[%s3609_s2 + $0x1b4] sm:$0xf]  ;;  %v270_v31 = vld [vmem:[%s3609_s2 + $0x1c4] sm:$0xff]  }
  0x47   :  { %263 = vst [vmem:[#allocation2 + $0x1b4] sm:$0xf] %v262_v27  ;;  %v266_v29 = vld [vmem:[%s3609_s2 + $0x1c0] sm:$0xf]  ;;  %v268_v30 = vld [vmem:[%s3609_s2 + $0x1b8] sm:$0xf] }
  0x48   :  { %265 = vst [vmem:[#allocation2 + $0x1b8] sm:$0xf] %v264_v28  ;;  %267 = vst [vmem:[#allocation2 + $0x1bc] sm:$0xf] %v266_v29  ;;  %v274_v32 = vld [vmem:[%s3609_s2 + $0x1d4] sm:$0xf] }
  0x49   :  { %269 = vst [vmem:[#allocation2 + $0x1c0] sm:$0xf] %v268_v30  ;;  %v276_v33 = vld [vmem:[%s3609_s2 + $0x1cc] sm:$0xf]  ;;  %271 = vst [vmem:[#allocation2 + $0x1c4] sm:$0xff] %v270_v31   ;;  %v294_v41 = vld [vmem:[%s3609_s2 + $0x1f4] sm:$0xff]  }
  0x4a   :  { %275 = vst [vmem:[#allocation2 + $0x1cc] sm:$0xf] %v274_v32  ;;  %277 = vst [vmem:[#allocation2 + $0x1d0] sm:$0xf] %v276_v33  ;;  %v278_v34 = vld [vmem:[%s3609_s2 + $0x1d8] sm:$0xf] }
  0x4b   :  { %v280_v35 = vld [vmem:[%s3609_s2 + $0x1d0] sm:$0xf]  ;;  %279 = vst [vmem:[#allocation2 + $0x1d4] sm:$0xf] %v278_v34  ;;  %283 = vst [vmem:[#allocation2 + $0x1dc] sm:$0xff] %v282_v36   ;;  %v318_v51 = vld [vmem:[%s3609_s2 + $0x224] sm:$0xff]  }
  0x4c   :  { %281 = vst [vmem:[#allocation2 + $0x1d8] sm:$0xf] %v280_v35  ;;  %v286_v37 = vld [vmem:[%s3609_s2 + $0x1ec] sm:$0xf]  ;;  %v288_v38 = vld [vmem:[%s3609_s2 + $0x1e4] sm:$0xf] }
  0x4d   :  { %v290_v39 = vld [vmem:[%s3609_s2 + $0x1f0] sm:$0xf]  ;;  %287 = vst [vmem:[#allocation2 + $0x1e4] sm:$0xf] %v286_v37  ;;  %289 = vst [vmem:[#allocation2 + $0x1e8] sm:$0xf] %v288_v38 }
  0x4e   :  { %291 = vst [vmem:[#allocation2 + $0x1ec] sm:$0xf] %v290_v39  ;;  %v292_v40 = vld [vmem:[%s3609_s2 + $0x1e8] sm:$0xf]  ;;  %v298_v42 = vld [vmem:[%s3609_s2 + $0x204] sm:$0xf] }
  0x4f   :  { %293 = vst [vmem:[#allocation2 + $0x1f0] sm:$0xf] %v292_v40  ;;  %295 = vst [vmem:[#allocation2 + $0x1f4] sm:$0xff] %v294_v41   ;;  %v300_v43 = vld [vmem:[%s3609_s2 + $0x1fc] sm:$0xf]  ;;  %v306_v46 = vld [vmem:[%s3609_s2 + $0x20c] sm:$0xff]  }
  0x50   :  { %299 = vst [vmem:[#allocation2 + $0x1fc] sm:$0xf] %v298_v42  ;;  %v302_v44 = vld [vmem:[%s3609_s2 + $0x208] sm:$0xf]  ;;  %v304_v45 = vld [vmem:[%s3609_s2 + $0x200] sm:$0xf] }
  0x51   :  { %301 = vst [vmem:[#allocation2 + $0x200] sm:$0xf] %v300_v43  ;;  %303 = vst [vmem:[#allocation2 + $0x204] sm:$0xf] %v302_v44  ;;  %v310_v47 = vld [vmem:[%s3609_s2 + $0x21c] sm:$0xf] }
  0x52   :  { %305 = vst [vmem:[#allocation2 + $0x208] sm:$0xf] %v304_v45  ;;  %v312_v48 = vld [vmem:[%s3609_s2 + $0x214] sm:$0xf]  ;;  %307 = vst [vmem:[#allocation2 + $0x20c] sm:$0xff] %v306_v46   ;;  %v330_v56 = vld [vmem:[%s3609_s2 + $0x23c] sm:$0xff]  }
  0x53   :  { %311 = vst [vmem:[#allocation2 + $0x214] sm:$0xf] %v310_v47  ;;  %313 = vst [vmem:[#allocation2 + $0x218] sm:$0xf] %v312_v48  ;;  %v314_v49 = vld [vmem:[%s3609_s2 + $0x220] sm:$0xf] }
  0x54   :  { %v316_v50 = vld [vmem:[%s3609_s2 + $0x218] sm:$0xf]  ;;  %315 = vst [vmem:[#allocation2 + $0x21c] sm:$0xf] %v314_v49  ;;  %319 = vst [vmem:[#allocation2 + $0x224] sm:$0xff] %v318_v51   ;;  %v354_v2 = vld [vmem:[%s3609_s2 + $0x26c] sm:$0xff]  }
  0x55   :  { %317 = vst [vmem:[#allocation2 + $0x220] sm:$0xf] %v316_v50  ;;  %v322_v52 = vld [vmem:[%s3609_s2 + $0x234] sm:$0xf]  ;;  %v324_v53 = vld [vmem:[%s3609_s2 + $0x22c] sm:$0xf] }
  0x56   :  { %v326_v54 = vld [vmem:[%s3609_s2 + $0x238] sm:$0xf]  ;;  %323 = vst [vmem:[#allocation2 + $0x22c] sm:$0xf] %v322_v52  ;;  %325 = vst [vmem:[#allocation2 + $0x230] sm:$0xf] %v324_v53 }
  0x57   :  { %327 = vst [vmem:[#allocation2 + $0x234] sm:$0xf] %v326_v54  ;;  %v328_v55 = vld [vmem:[%s3609_s2 + $0x230] sm:$0xf]  ;;  %v334_v57 = vld [vmem:[%s3609_s2 + $0x24c] sm:$0xf] }
  0x58   :  { %329 = vst [vmem:[#allocation2 + $0x238] sm:$0xf] %v328_v55  ;;  %331 = vst [vmem:[#allocation2 + $0x23c] sm:$0xff] %v330_v56   ;;  %v336_v58 = vld [vmem:[%s3609_s2 + $0x244] sm:$0xf]  ;;  %v342_v61 = vld [vmem:[%s3609_s2 + $0x254] sm:$0xff]  }
  0x59   :  { %335 = vst [vmem:[#allocation2 + $0x244] sm:$0xf] %v334_v57  ;;  %v338_v59 = vld [vmem:[%s3609_s2 + $0x250] sm:$0xf]  ;;  %v340_v60 = vld [vmem:[%s3609_s2 + $0x248] sm:$0xf] }
  0x5a   :  { %337 = vst [vmem:[#allocation2 + $0x248] sm:$0xf] %v336_v58  ;;  %339 = vst [vmem:[#allocation2 + $0x24c] sm:$0xf] %v338_v59  ;;  %v346_v62 = vld [vmem:[%s3609_s2 + $0x264] sm:$0xf] }
  0x5b   :  { %341 = vst [vmem:[#allocation2 + $0x250] sm:$0xf] %v340_v60  ;;  %v348_v63 = vld [vmem:[%s3609_s2 + $0x25c] sm:$0xf]  ;;  %343 = vst [vmem:[#allocation2 + $0x254] sm:$0xff] %v342_v61   ;;  %v366_v7 = vld [vmem:[%s3609_s2 + $0x284] sm:$0xff]  }
  0x5c   :  { %347 = vst [vmem:[#allocation2 + $0x25c] sm:$0xf] %v346_v62  ;;  %349 = vst [vmem:[#allocation2 + $0x260] sm:$0xf] %v348_v63  ;;  %v350_v0 = vld [vmem:[%s3609_s2 + $0x268] sm:$0xf] }
  0x5d   :  { %v352_v1 = vld [vmem:[%s3609_s2 + $0x260] sm:$0xf]  ;;  %351 = vst [vmem:[#allocation2 + $0x264] sm:$0xf] %v350_v0  ;;  %355 = vst [vmem:[#allocation2 + $0x26c] sm:$0xff] %v354_v2   ;;  %v390_v17 = vld [vmem:[%s3609_s2 + $0x2b4] sm:$0xff]  }
  0x5e   :  { %353 = vst [vmem:[#allocation2 + $0x268] sm:$0xf] %v352_v1  ;;  %v358_v3 = vld [vmem:[%s3609_s2 + $0x27c] sm:$0xf]  ;;  %v360_v4 = vld [vmem:[%s3609_s2 + $0x274] sm:$0xf] }
  0x5f   :  { %v362_v5 = vld [vmem:[%s3609_s2 + $0x280] sm:$0xf]  ;;  %359 = vst [vmem:[#allocation2 + $0x274] sm:$0xf] %v358_v3  ;;  %361 = vst [vmem:[#allocation2 + $0x278] sm:$0xf] %v360_v4 }
  0x60   :  { %363 = vst [vmem:[#allocation2 + $0x27c] sm:$0xf] %v362_v5  ;;  %v364_v6 = vld [vmem:[%s3609_s2 + $0x278] sm:$0xf]  ;;  %v370_v8 = vld [vmem:[%s3609_s2 + $0x294] sm:$0xf] }
  0x61   :  { %365 = vst [vmem:[#allocation2 + $0x280] sm:$0xf] %v364_v6  ;;  %367 = vst [vmem:[#allocation2 + $0x284] sm:$0xff] %v366_v7   ;;  %v372_v9 = vld [vmem:[%s3609_s2 + $0x28c] sm:$0xf]  ;;  %v378_v12 = vld [vmem:[%s3609_s2 + $0x29c] sm:$0xff]  }
  0x62   :  { %371 = vst [vmem:[#allocation2 + $0x28c] sm:$0xf] %v370_v8  ;;  %v374_v10 = vld [vmem:[%s3609_s2 + $0x298] sm:$0xf]  ;;  %v376_v11 = vld [vmem:[%s3609_s2 + $0x290] sm:$0xf] }
  0x63   :  { %373 = vst [vmem:[#allocation2 + $0x290] sm:$0xf] %v372_v9  ;;  %375 = vst [vmem:[#allocation2 + $0x294] sm:$0xf] %v374_v10  ;;  %v382_v13 = vld [vmem:[%s3609_s2 + $0x2ac] sm:$0xf] }
  0x64   :  { %377 = vst [vmem:[#allocation2 + $0x298] sm:$0xf] %v376_v11  ;;  %v384_v14 = vld [vmem:[%s3609_s2 + $0x2a4] sm:$0xf]  ;;  %379 = vst [vmem:[#allocation2 + $0x29c] sm:$0xff] %v378_v12   ;;  %v402_v22 = vld [vmem:[%s3609_s2 + $0x2cc] sm:$0xff]  }
  0x65   :  { %383 = vst [vmem:[#allocation2 + $0x2a4] sm:$0xf] %v382_v13  ;;  %385 = vst [vmem:[#allocation2 + $0x2a8] sm:$0xf] %v384_v14  ;;  %v386_v15 = vld [vmem:[%s3609_s2 + $0x2b0] sm:$0xf] }
  0x66   :  { %v388_v16 = vld [vmem:[%s3609_s2 + $0x2a8] sm:$0xf]  ;;  %387 = vst [vmem:[#allocation2 + $0x2ac] sm:$0xf] %v386_v15  ;;  %391 = vst [vmem:[#allocation2 + $0x2b4] sm:$0xff] %v390_v17   ;;  %v426_v32 = vld [vmem:[%s3609_s2 + $0x2fc] sm:$0xff]  }
  0x67   :  { %389 = vst [vmem:[#allocation2 + $0x2b0] sm:$0xf] %v388_v16  ;;  %v394_v18 = vld [vmem:[%s3609_s2 + $0x2c4] sm:$0xf]  ;;  %v396_v19 = vld [vmem:[%s3609_s2 + $0x2bc] sm:$0xf] }
  0x68   :  { %v398_v20 = vld [vmem:[%s3609_s2 + $0x2c8] sm:$0xf]  ;;  %395 = vst [vmem:[#allocation2 + $0x2bc] sm:$0xf] %v394_v18  ;;  %397 = vst [vmem:[#allocation2 + $0x2c0] sm:$0xf] %v396_v19 }
  0x69   :  { %399 = vst [vmem:[#allocation2 + $0x2c4] sm:$0xf] %v398_v20  ;;  %v400_v21 = vld [vmem:[%s3609_s2 + $0x2c0] sm:$0xf]  ;;  %v406_v23 = vld [vmem:[%s3609_s2 + $0x2dc] sm:$0xf] }
  0x6a   :  { %401 = vst [vmem:[#allocation2 + $0x2c8] sm:$0xf] %v400_v21  ;;  %403 = vst [vmem:[#allocation2 + $0x2cc] sm:$0xff] %v402_v22   ;;  %v408_v24 = vld [vmem:[%s3609_s2 + $0x2d4] sm:$0xf]  ;;  %v414_v27 = vld [vmem:[%s3609_s2 + $0x2e4] sm:$0xff]  }
  0x6b   :  { %407 = vst [vmem:[#allocation2 + $0x2d4] sm:$0xf] %v406_v23  ;;  %v410_v25 = vld [vmem:[%s3609_s2 + $0x2e0] sm:$0xf]  ;;  %v412_v26 = vld [vmem:[%s3609_s2 + $0x2d8] sm:$0xf] }
  0x6c   :  { %409 = vst [vmem:[#allocation2 + $0x2d8] sm:$0xf] %v408_v24  ;;  %411 = vst [vmem:[#allocation2 + $0x2dc] sm:$0xf] %v410_v25  ;;  %v418_v28 = vld [vmem:[%s3609_s2 + $0x2f4] sm:$0xf] }
  0x6d   :  { %413 = vst [vmem:[#allocation2 + $0x2e0] sm:$0xf] %v412_v26  ;;  %v420_v29 = vld [vmem:[%s3609_s2 + $0x2ec] sm:$0xf]  ;;  %415 = vst [vmem:[#allocation2 + $0x2e4] sm:$0xff] %v414_v27   ;;  %v438_v37 = vld [vmem:[%s3609_s2 + $0x314] sm:$0xff]  }
  0x6e   :  { %419 = vst [vmem:[#allocation2 + $0x2ec] sm:$0xf] %v418_v28  ;;  %421 = vst [vmem:[#allocation2 + $0x2f0] sm:$0xf] %v420_v29  ;;  %v422_v30 = vld [vmem:[%s3609_s2 + $0x2f8] sm:$0xf] }
  0x6f   :  { %v424_v31 = vld [vmem:[%s3609_s2 + $0x2f0] sm:$0xf]  ;;  %423 = vst [vmem:[#allocation2 + $0x2f4] sm:$0xf] %v422_v30  ;;  %427 = vst [vmem:[#allocation2 + $0x2fc] sm:$0xff] %v426_v32   ;;  %v462_v47 = vld [vmem:[%s3609_s2 + $0x344] sm:$0xff]  }
  0x70   :  { %425 = vst [vmem:[#allocation2 + $0x2f8] sm:$0xf] %v424_v31  ;;  %v430_v33 = vld [vmem:[%s3609_s2 + $0x30c] sm:$0xf]  ;;  %v432_v34 = vld [vmem:[%s3609_s2 + $0x304] sm:$0xf] }
  0x71   :  { %v434_v35 = vld [vmem:[%s3609_s2 + $0x310] sm:$0xf]  ;;  %431 = vst [vmem:[#allocation2 + $0x304] sm:$0xf] %v430_v33  ;;  %433 = vst [vmem:[#allocation2 + $0x308] sm:$0xf] %v432_v34 }
  0x72   :  { %435 = vst [vmem:[#allocation2 + $0x30c] sm:$0xf] %v434_v35  ;;  %v436_v36 = vld [vmem:[%s3609_s2 + $0x308] sm:$0xf]  ;;  %v442_v38 = vld [vmem:[%s3609_s2 + $0x324] sm:$0xf] }
  0x73   :  { %437 = vst [vmem:[#allocation2 + $0x310] sm:$0xf] %v436_v36  ;;  %439 = vst [vmem:[#allocation2 + $0x314] sm:$0xff] %v438_v37   ;;  %v444_v39 = vld [vmem:[%s3609_s2 + $0x31c] sm:$0xf]  ;;  %v450_v42 = vld [vmem:[%s3609_s2 + $0x32c] sm:$0xff]  }
  0x74   :  { %443 = vst [vmem:[#allocation2 + $0x31c] sm:$0xf] %v442_v38  ;;  %v446_v40 = vld [vmem:[%s3609_s2 + $0x328] sm:$0xf]  ;;  %v448_v41 = vld [vmem:[%s3609_s2 + $0x320] sm:$0xf] }
  0x75   :  { %445 = vst [vmem:[#allocation2 + $0x320] sm:$0xf] %v444_v39  ;;  %447 = vst [vmem:[#allocation2 + $0x324] sm:$0xf] %v446_v40  ;;  %v454_v43 = vld [vmem:[%s3609_s2 + $0x33c] sm:$0xf] }
  0x76   :  { %449 = vst [vmem:[#allocation2 + $0x328] sm:$0xf] %v448_v41  ;;  %v456_v44 = vld [vmem:[%s3609_s2 + $0x334] sm:$0xf]  ;;  %451 = vst [vmem:[#allocation2 + $0x32c] sm:$0xff] %v450_v42   ;;  %v474_v52 = vld [vmem:[%s3609_s2 + $0x35c] sm:$0xff]  }
  0x77   :  { %455 = vst [vmem:[#allocation2 + $0x334] sm:$0xf] %v454_v43  ;;  %457 = vst [vmem:[#allocation2 + $0x338] sm:$0xf] %v456_v44  ;;  %v458_v45 = vld [vmem:[%s3609_s2 + $0x340] sm:$0xf] }
  0x78   :  { %v460_v46 = vld [vmem:[%s3609_s2 + $0x338] sm:$0xf]  ;;  %459 = vst [vmem:[#allocation2 + $0x33c] sm:$0xf] %v458_v45  ;;  %463 = vst [vmem:[#allocation2 + $0x344] sm:$0xff] %v462_v47   ;;  %v498_v62 = vld [vmem:[%s3609_s2 + $0x38c] sm:$0xff]  }
  0x79   :  { %461 = vst [vmem:[#allocation2 + $0x340] sm:$0xf] %v460_v46  ;;  %v466_v48 = vld [vmem:[%s3609_s2 + $0x354] sm:$0xf]  ;;  %v468_v49 = vld [vmem:[%s3609_s2 + $0x34c] sm:$0xf] }
  0x7a   :  { %v470_v50 = vld [vmem:[%s3609_s2 + $0x358] sm:$0xf]  ;;  %467 = vst [vmem:[#allocation2 + $0x34c] sm:$0xf] %v466_v48  ;;  %469 = vst [vmem:[#allocation2 + $0x350] sm:$0xf] %v468_v49 }
  0x7b   :  { %471 = vst [vmem:[#allocation2 + $0x354] sm:$0xf] %v470_v50  ;;  %v472_v51 = vld [vmem:[%s3609_s2 + $0x350] sm:$0xf]  ;;  %v478_v53 = vld [vmem:[%s3609_s2 + $0x36c] sm:$0xf] }
  0x7c   :  { %473 = vst [vmem:[#allocation2 + $0x358] sm:$0xf] %v472_v51  ;;  %475 = vst [vmem:[#allocation2 + $0x35c] sm:$0xff] %v474_v52   ;;  %v480_v54 = vld [vmem:[%s3609_s2 + $0x364] sm:$0xf]  ;;  %v486_v57 = vld [vmem:[%s3609_s2 + $0x374] sm:$0xff]  }
  0x7d   :  { %479 = vst [vmem:[#allocation2 + $0x364] sm:$0xf] %v478_v53  ;;  %v482_v55 = vld [vmem:[%s3609_s2 + $0x370] sm:$0xf]  ;;  %v484_v56 = vld [vmem:[%s3609_s2 + $0x368] sm:$0xf] }
  0x7e   :  { %481 = vst [vmem:[#allocation2 + $0x368] sm:$0xf] %v480_v54  ;;  %483 = vst [vmem:[#allocation2 + $0x36c] sm:$0xf] %v482_v55  ;;  %v490_v58 = vld [vmem:[%s3609_s2 + $0x384] sm:$0xf] }
  0x7f   :  { %485 = vst [vmem:[#allocation2 + $0x370] sm:$0xf] %v484_v56  ;;  %v492_v59 = vld [vmem:[%s3609_s2 + $0x37c] sm:$0xf]  ;;  %487 = vst [vmem:[#allocation2 + $0x374] sm:$0xff] %v486_v57   ;;  %v510_v3 = vld [vmem:[%s3609_s2 + $0x3a4] sm:$0xff]  }
  0x80   :  { %491 = vst [vmem:[#allocation2 + $0x37c] sm:$0xf] %v490_v58  ;;  %493 = vst [vmem:[#allocation2 + $0x380] sm:$0xf] %v492_v59  ;;  %v494_v60 = vld [vmem:[%s3609_s2 + $0x388] sm:$0xf] }
  0x81   :  { %v496_v61 = vld [vmem:[%s3609_s2 + $0x380] sm:$0xf]  ;;  %495 = vst [vmem:[#allocation2 + $0x384] sm:$0xf] %v494_v60  ;;  %499 = vst [vmem:[#allocation2 + $0x38c] sm:$0xff] %v498_v62   ;;  %v534_v13 = vld [vmem:[%s3609_s2 + $0x3d4] sm:$0xff]  }
  0x82   :  { %497 = vst [vmem:[#allocation2 + $0x388] sm:$0xf] %v496_v61  ;;  %v502_v63 = vld [vmem:[%s3609_s2 + $0x39c] sm:$0xf]  ;;  %v504_v0 = vld [vmem:[%s3609_s2 + $0x394] sm:$0xf] }
  0x83   :  { %v506_v1 = vld [vmem:[%s3609_s2 + $0x3a0] sm:$0xf]  ;;  %503 = vst [vmem:[#allocation2 + $0x394] sm:$0xf] %v502_v63  ;;  %505 = vst [vmem:[#allocation2 + $0x398] sm:$0xf] %v504_v0 }
  0x84   :  { %507 = vst [vmem:[#allocation2 + $0x39c] sm:$0xf] %v506_v1  ;;  %v508_v2 = vld [vmem:[%s3609_s2 + $0x398] sm:$0xf]  ;;  %v514_v4 = vld [vmem:[%s3609_s2 + $0x3b4] sm:$0xf] }
  0x85   :  { %509 = vst [vmem:[#allocation2 + $0x3a0] sm:$0xf] %v508_v2  ;;  %511 = vst [vmem:[#allocation2 + $0x3a4] sm:$0xff] %v510_v3   ;;  %v516_v5 = vld [vmem:[%s3609_s2 + $0x3ac] sm:$0xf]  ;;  %v522_v8 = vld [vmem:[%s3609_s2 + $0x3bc] sm:$0xff]  }
  0x86   :  { %515 = vst [vmem:[#allocation2 + $0x3ac] sm:$0xf] %v514_v4  ;;  %v518_v6 = vld [vmem:[%s3609_s2 + $0x3b8] sm:$0xf]  ;;  %v520_v7 = vld [vmem:[%s3609_s2 + $0x3b0] sm:$0xf] }
  0x87   :  { %517 = vst [vmem:[#allocation2 + $0x3b0] sm:$0xf] %v516_v5  ;;  %519 = vst [vmem:[#allocation2 + $0x3b4] sm:$0xf] %v518_v6  ;;  %v526_v9 = vld [vmem:[%s3609_s2 + $0x3cc] sm:$0xf] }
  0x88   :  { %521 = vst [vmem:[#allocation2 + $0x3b8] sm:$0xf] %v520_v7  ;;  %v528_v10 = vld [vmem:[%s3609_s2 + $0x3c4] sm:$0xf]  ;;  %523 = vst [vmem:[#allocation2 + $0x3bc] sm:$0xff] %v522_v8   ;;  %v546_v18 = vld [vmem:[%s3609_s2 + $0x3ec] sm:$0xff]  }
  0x89   :  { %527 = vst [vmem:[#allocation2 + $0x3c4] sm:$0xf] %v526_v9  ;;  %529 = vst [vmem:[#allocation2 + $0x3c8] sm:$0xf] %v528_v10  ;;  %v530_v11 = vld [vmem:[%s3609_s2 + $0x3d0] sm:$0xf] }
  0x8a   :  { %v532_v12 = vld [vmem:[%s3609_s2 + $0x3c8] sm:$0xf]  ;;  %531 = vst [vmem:[#allocation2 + $0x3cc] sm:$0xf] %v530_v11  ;;  %535 = vst [vmem:[#allocation2 + $0x3d4] sm:$0xff] %v534_v13   ;;  %v570_v28 = vld [vmem:[%s3609_s2 + $0x41c] sm:$0xff]  }
  0x8b   :  { %533 = vst [vmem:[#allocation2 + $0x3d0] sm:$0xf] %v532_v12  ;;  %v538_v14 = vld [vmem:[%s3609_s2 + $0x3e4] sm:$0xf]  ;;  %v540_v15 = vld [vmem:[%s3609_s2 + $0x3dc] sm:$0xf] }
  0x8c   :  { %v542_v16 = vld [vmem:[%s3609_s2 + $0x3e8] sm:$0xf]  ;;  %539 = vst [vmem:[#allocation2 + $0x3dc] sm:$0xf] %v538_v14  ;;  %541 = vst [vmem:[#allocation2 + $0x3e0] sm:$0xf] %v540_v15 }
  0x8d   :  { %543 = vst [vmem:[#allocation2 + $0x3e4] sm:$0xf] %v542_v16  ;;  %v544_v17 = vld [vmem:[%s3609_s2 + $0x3e0] sm:$0xf]  ;;  %v550_v19 = vld [vmem:[%s3609_s2 + $0x3fc] sm:$0xf] }
  0x8e   :  { %545 = vst [vmem:[#allocation2 + $0x3e8] sm:$0xf] %v544_v17  ;;  %547 = vst [vmem:[#allocation2 + $0x3ec] sm:$0xff] %v546_v18   ;;  %v552_v20 = vld [vmem:[%s3609_s2 + $0x3f4] sm:$0xf]  ;;  %v558_v23 = vld [vmem:[%s3609_s2 + $0x404] sm:$0xff]  }
  0x8f   :  { %551 = vst [vmem:[#allocation2 + $0x3f4] sm:$0xf] %v550_v19  ;;  %v554_v21 = vld [vmem:[%s3609_s2 + $0x400] sm:$0xf]  ;;  %v556_v22 = vld [vmem:[%s3609_s2 + $0x3f8] sm:$0xf] }
  0x90   :  { %553 = vst [vmem:[#allocation2 + $0x3f8] sm:$0xf] %v552_v20  ;;  %555 = vst [vmem:[#allocation2 + $0x3fc] sm:$0xf] %v554_v21  ;;  %v562_v24 = vld [vmem:[%s3609_s2 + $0x414] sm:$0xf] }
  0x91   :  { %557 = vst [vmem:[#allocation2 + $0x400] sm:$0xf] %v556_v22  ;;  %v564_v25 = vld [vmem:[%s3609_s2 + $0x40c] sm:$0xf]  ;;  %559 = vst [vmem:[#allocation2 + $0x404] sm:$0xff] %v558_v23   ;;  %v582_v33 = vld [vmem:[%s3609_s2 + $0x434] sm:$0xff]  }
  0x92   :  { %563 = vst [vmem:[#allocation2 + $0x40c] sm:$0xf] %v562_v24  ;;  %565 = vst [vmem:[#allocation2 + $0x410] sm:$0xf] %v564_v25  ;;  %v566_v26 = vld [vmem:[%s3609_s2 + $0x418] sm:$0xf] }
  0x93   :  { %v568_v27 = vld [vmem:[%s3609_s2 + $0x410] sm:$0xf]  ;;  %567 = vst [vmem:[#allocation2 + $0x414] sm:$0xf] %v566_v26  ;;  %571 = vst [vmem:[#allocation2 + $0x41c] sm:$0xff] %v570_v28   ;;  %v606_v43 = vld [vmem:[%s3609_s2 + $0x464] sm:$0xff]  }
  0x94   :  { %569 = vst [vmem:[#allocation2 + $0x418] sm:$0xf] %v568_v27  ;;  %v574_v29 = vld [vmem:[%s3609_s2 + $0x42c] sm:$0xf]  ;;  %v576_v30 = vld [vmem:[%s3609_s2 + $0x424] sm:$0xf] }
  0x95   :  { %v578_v31 = vld [vmem:[%s3609_s2 + $0x430] sm:$0xf]  ;;  %575 = vst [vmem:[#allocation2 + $0x424] sm:$0xf] %v574_v29  ;;  %577 = vst [vmem:[#allocation2 + $0x428] sm:$0xf] %v576_v30 }
  0x96   :  { %579 = vst [vmem:[#allocation2 + $0x42c] sm:$0xf] %v578_v31  ;;  %v580_v32 = vld [vmem:[%s3609_s2 + $0x428] sm:$0xf]  ;;  %v586_v34 = vld [vmem:[%s3609_s2 + $0x444] sm:$0xf] }
  0x97   :  { %581 = vst [vmem:[#allocation2 + $0x430] sm:$0xf] %v580_v32  ;;  %583 = vst [vmem:[#allocation2 + $0x434] sm:$0xff] %v582_v33   ;;  %v588_v35 = vld [vmem:[%s3609_s2 + $0x43c] sm:$0xf]  ;;  %v594_v38 = vld [vmem:[%s3609_s2 + $0x44c] sm:$0xff]  }
  0x98   :  { %587 = vst [vmem:[#allocation2 + $0x43c] sm:$0xf] %v586_v34  ;;  %v590_v36 = vld [vmem:[%s3609_s2 + $0x448] sm:$0xf]  ;;  %v592_v37 = vld [vmem:[%s3609_s2 + $0x440] sm:$0xf] }
  0x99   :  { %589 = vst [vmem:[#allocation2 + $0x440] sm:$0xf] %v588_v35  ;;  %591 = vst [vmem:[#allocation2 + $0x444] sm:$0xf] %v590_v36  ;;  %v598_v39 = vld [vmem:[%s3609_s2 + $0x45c] sm:$0xf] }
  0x9a   :  { %593 = vst [vmem:[#allocation2 + $0x448] sm:$0xf] %v592_v37  ;;  %v600_v40 = vld [vmem:[%s3609_s2 + $0x454] sm:$0xf]  ;;  %595 = vst [vmem:[#allocation2 + $0x44c] sm:$0xff] %v594_v38   ;;  %s2296_s8 = sld [smem:[#allocation5 + $0x22]] }
  0x9b   :  { %599 = vst [vmem:[#allocation2 + $0x454] sm:$0xf] %v598_v39  ;;  %601 = vst [vmem:[#allocation2 + $0x458] sm:$0xf] %v600_v40  ;;  %v602_v41 = vld [vmem:[%s3609_s2 + $0x460] sm:$0xf] }
  0x9c   :  { %v604_v42 = vld [vmem:[%s3609_s2 + $0x458] sm:$0xf]  ;;  %603 = vst [vmem:[#allocation2 + $0x45c] sm:$0xf] %v602_v41  ;;  %607 = vst [vmem:[#allocation2 + $0x464] sm:$0xff] %v606_v43  }
  0x9d   :  { %605 = vst [vmem:[#allocation2 + $0x460] sm:$0xf] %v604_v42  ;;  %v610_v44 = vld [vmem:[%s3609_s2 + $0x474] sm:$0xf]  ;;  %v612_v45 = vld [vmem:[%s3609_s2 + $0x46c] sm:$0xf] }
  0x9e   :  { %v614_v46 = vld [vmem:[%s3609_s2 + $0x478] sm:$0xf]  ;;  %611 = vst [vmem:[#allocation2 + $0x46c] sm:$0xf] %v610_v44  ;;  %613 = vst [vmem:[#allocation2 + $0x470] sm:$0xf] %v612_v45 }
  0x9f   :  { %615 = vst [vmem:[#allocation2 + $0x474] sm:$0xf] %v614_v46  ;;  %v616_v47 = vld [vmem:[%s3609_s2 + $0x470] sm:$0xf]  ;;  %v618_v48 = vld [vmem:[%s3609_s2 + $0x47c] sm:$0xf] }
  0xa0   :  { %617 = vst [vmem:[#allocation2 + $0x478] sm:$0xf] %v616_v47  ;;  %619 = vst [vmem:[#allocation2 + $0x47c] sm:$0xf] %v618_v48 }
  0xa1   :  { %1226 = vsyncadd [#allocation3], 18432  ;;  %s2288_s9 = sld [smem:[#allocation5 + $0x1a]]  ;;  %s2300_s10 = sld [smem:[#allocation5 + $0x26]]  ;;  %vm1489_vm0 = vcmask 1040384  }
  0xa2   :  { %s2292_s11 = sld [smem:[#allocation5 + $0x1e]]  ;;  %s2270_s12 = sld [smem:[#allocation5 + $0x8]] }
  0xa3   :  { %s2266_s13 = sld [smem:[#allocation5 + $0x4]]  ;;  %s2278_s14 = sld [smem:[#allocation5 + $0x10]] }
  0xa4   :  { %s1416_s17 = scalar_lea.vmem %s3608_s1, %s2296_s8  ;;  %s2274_s18 = sld [smem:[#allocation5 + $0xc]] }
  0xa5   :  { %v1417_v49 = vld [vmem:[%s1416_s17] sm:$0x1]  ;;  %s2522_s24 = smov 32   ;;  %s2285_s30 = sld [smem:[#allocation5 + $0x17]] }
  0xa6   :  { %1418 = vrot.lane.b32.xlu1 %v1417_v49, %s2522_s24  ;;  %s2293_s17 = sld [smem:[#allocation5 + $0x1f]]  ;;  %s2267_s19 = sld [smem:[#allocation5 + $0x5]] }
  0xa7   :  { %s1372_s2 = scalar_lea.vmem %s3608_s1, %s2288_s9  ;;  %s1438_s23 = scalar_lea.vmem %s3608_s1, %s2300_s10 }
  0xa8   :  { %v1373_v50 = vld [vmem:[%s1372_s2] sm:$0x1]  ;;  %s1394_s27 = scalar_lea.vmem %s3608_s1, %s2292_s11  ;;  %s1272_s29 = scalar_lea.vmem %s3608_s1, %s2270_s12 }
  0xa9   :  { %1374 = vrot.lane.b32.xlu0 %v1373_v50, %s2522_s24  ;;  %v1439_v51 = vld [vmem:[%s1438_s23] sm:$0x1]  ;;  %s1250_s9 = scalar_lea.vmem %s3608_s1, %s2266_s13  ;;  %s2284_s10 = sld [smem:[#allocation5 + $0x16]] }
  0xaa   :  { %v1395_v52 = vld [vmem:[%s1394_s27] sm:$0x1]  ;;  %1440 = vrot.lane.b32.xlu1 %v1439_v51, %s2522_s24  ;;  %s1316_s16 = scalar_lea.vmem %s3608_s1, %s2278_s14  ;;  %s1294_s12 = scalar_lea.vmem %s3608_s1, %s2274_s18 }
  0xab   :  { %v1273_v53 = vld [vmem:[%s1272_s29] sm:$0x1]  ;;  %s2289_s2 = sld [smem:[#allocation5 + $0x1b]]  ;;  %s1356_s22 = scalar_lea.vmem %s3608_s1, %s2285_s30 }
  0xac   :  { %v1251_v54 = vld [vmem:[%s1250_s9] sm:$0x1]  ;;  %s2301_s23 = sld [smem:[#allocation5 + $0x27]]  ;;  %s2297_s27 = sld [smem:[#allocation5 + $0x23]] }
  0xad   :  { %1396 = vrot.lane.b32.xlu0 %v1395_v52, %s2522_s24  ;;  %v1317_v55 = vld [vmem:[%s1316_s16] sm:$0x1]  ;;  %s1400_s0 = scalar_lea.vmem %s3608_s1, %s2293_s17  ;;  %s1227_s29 = sld [smem:[#allocation5]] }
  0xae   :  { %1274 = vrot.lane.b32.xlu1 %v1273_v53, %s2522_s24  ;;  %v1295_v56 = vld [vmem:[%s1294_s12] sm:$0x1]  ;;  %s2304_s9 = sld [smem:[#allocation5 + $0x2a]]  ;;  %s2523_s11 = smov 64  }
  0xaf   :  { %s1350_s14 = scalar_lea.vmem %s3608_s1, %s2284_s10  ;;  %v1357_v57 = vld [vmem:[%s1356_s22] sm:$0x1]  ;;  %s2263_s13 = sld [smem:[#allocation5 + $0x1]] }
  0xb0   :  { %v1351_v58 = vld [vmem:[%s1350_s14] sm:$0x1]  ;;  %s2275_s25 = sld [smem:[#allocation5 + $0xd]]  ;;  %s2271_s18 = sld [smem:[#allocation5 + $0x9]] }
  0xb1   :  { %1252 = vrot.lane.b32.xlu0 %v1251_v54, %s2522_s24  ;;  %s1378_s30 = scalar_lea.vmem %s3608_s1, %s2289_s2  ;;  %v1401_v59 = vld [vmem:[%s1400_s0] sm:$0x1]  ;;  %s1256_s0 = scalar_lea.vmem %s3608_s1, %s2267_s19 }
  0xb2   :  { %1318 = vrot.lane.b32.xlu1 %v1317_v55, %s2522_s24  ;;  %v1379_v60 = vld [vmem:[%s1378_s30] sm:$0x1]  ;;  %s1444_s16 = scalar_lea.vmem %s3608_s1, %s2301_s23  ;;  %s1422_s12 = scalar_lea.vmem %s3608_s1, %s2297_s27 }
  0xb3   :  { %v1445_v61 = vld [vmem:[%s1444_s16] sm:$0x1]  ;;  %s1228_s22 = scalar_lea.vmem %s3608_s1, %s1227_s29  ;;  %s2282_s7 = sld [smem:[#allocation5 + $0x14]] }
  0xb4   :  { %v1423_v62 = vld [vmem:[%s1422_s12] sm:$0x1]  ;;  %s1460_s23 = scalar_lea.vmem %s3608_s1, %s2304_s9  ;;  %s2279_s10 = sld [smem:[#allocation5 + $0x11]] }
  0xb5   :  { %1296 = vrot.lane.b32.xlu0 %v1295_v56, %s2522_s24  ;;  %v1229_v63 = vld [vmem:[%s1228_s22] sm:$0x1]  ;;  %s1234_s29 = scalar_lea.vmem %s3608_s1, %s2263_s13  ;;  %s2290_s20 = sld [smem:[#allocation5 + $0x1c]] }
  0xb6   :  { %1358 = vrot.lane.b32.xlu1 %v1357_v57, %s2523_s11  ;;  %v1461_v0 = vld [vmem:[%s1460_s23] sm:$0x1]  ;;  %s1300_s16 = scalar_lea.vmem %s3608_s1, %s2275_s25  ;;  %s1278_s19 = scalar_lea.vmem %s3608_s1, %s2271_s18 }
  0xb7   :  { %v1257_v1 = vld [vmem:[%s1256_s0] sm:$0x1]  ;;  %s2286_s2 = sld [smem:[#allocation5 + $0x18]]  ;;  %s2298_s26 = sld [smem:[#allocation5 + $0x24]] }
  0xb8   :  { %v1235_v2 = vld [vmem:[%s1234_s29] sm:$0x1]  ;;  %s2294_s27 = sld [smem:[#allocation5 + $0x20]]  ;;  %s2305_s8 = sld [smem:[#allocation5 + $0x2b]] }
  0xb9   :  { %1352 = vrot.lane.b32.xlu0 %v1351_v58, %s2522_s24  ;;  %v1301_v3 = vld [vmem:[%s1300_s16] sm:$0x1]  ;;  %s1338_s22 = scalar_lea.vmem %s3608_s1, %s2282_s7  ;;  %s2302_s9 = sld [smem:[#allocation5 + $0x28]] }
  0xba   :  { %1402 = vrot.lane.b32.xlu1 %v1401_v59, %s2523_s11  ;;  %v1279_v4 = vld [vmem:[%s1278_s19] sm:$0x1]  ;;  %s1322_s25 = scalar_lea.vmem %s3608_s1, %s2279_s10  ;;  %s2268_s17 = sld [smem:[#allocation5 + $0x6]] }
  0xbb   :  { %v1339_v5 = vld [vmem:[%s1338_s22] sm:$0x1]  ;;  %s1384_s0 = scalar_lea.vmem %s3608_s1, %s2290_s20  ;;  %s2264_s13 = sld [smem:[#allocation5 + $0x2]] }
  0xbc   :  { %v1323_v6 = vld [vmem:[%s1322_s25] sm:$0x1]  ;;  %s2524_s21 = smov 96   ;;  %s2276_s14 = sld [smem:[#allocation5 + $0xe]] }
  0xbd   :  { %1380 = vrot.lane.b32.xlu0 %v1379_v60, %s2523_s11  ;;  %s1362_s7 = scalar_lea.vmem %s3608_s1, %s2286_s2  ;;  %v1385_v7 = vld [vmem:[%s1384_s0] sm:$0x1]  ;;  %s1428_s16 = scalar_lea.vmem %s3608_s1, %s2298_s26 }
  0xbe   :  { %1446 = vrot.lane.b32.xlu1 %v1445_v61, %s2523_s11  ;;  %v1363_v8 = vld [vmem:[%s1362_s7] sm:$0x1]  ;;  %s1406_s20 = scalar_lea.vmem %s3608_s1, %s2294_s27  ;;  %s1466_s22 = scalar_lea.vmem %s3608_s1, %s2305_s8 }
  0xbf   :  { %v1429_v9 = vld [vmem:[%s1428_s16] sm:$0x1]  ;;  %s1450_s25 = scalar_lea.vmem %s3608_s1, %s2302_s9  ;;  %s2272_s18 = sld [smem:[#allocation5 + $0xa]] }
  0xc0   :  { %v1407_v10 = vld [vmem:[%s1406_s20] sm:$0x1]  ;;  %s1262_s0 = scalar_lea.vmem %s3608_s1, %s2268_s17  ;;  %s2283_s30 = sld [smem:[#allocation5 + $0x15]] }
  0xc1   :  { %1424 = vrot.lane.b32.xlu0 %v1423_v62, %s2523_s11  ;;  %v1467_v11 = vld [vmem:[%s1466_s22] sm:$0x1]  ;;  %s1240_s8 = scalar_lea.vmem %s3608_s1, %s2264_s13  ;;  %s2280_s10 = sld [smem:[#allocation5 + $0x12]] }
  0xc2   :  { %1230 = vrot.lane.b32.xlu1 %v1229_v63, %s2522_s24  ;;  %v1451_v12 = vld [vmem:[%s1450_s25] sm:$0x1]  ;;  %s1306_s16 = scalar_lea.vmem %s3608_s1, %s2276_s14  ;;  %s2265_s14 = sld [smem:[#allocation5 + $0x3]] }
  0xc3   :  { %v1263_v13 = vld [vmem:[%s1262_s0] sm:$0x1]  ;;  %s2291_s26 = sld [smem:[#allocation5 + $0x1d]]  ;;  %s3446_s0 = sld [smem:[#allocation5 + $0xb]] }
  0xc4   :  { %v1241_v14 = vld [vmem:[%s1240_s8] sm:$0x1]  ;;  %s2299_s25 = sld [smem:[#allocation5 + $0x25]]  ;;  %s3450_s29 = sld [smem:[#allocation5 + $0x29]] }
  0xc5   :  { %1462 = vrot.lane.b32.xlu0 %v1461_v0, %s2522_s24  ;;  %s1284_s17 = scalar_lea.vmem %s3608_s1, %s2272_s18  ;;  %v1307_v15 = vld [vmem:[%s1306_s16] sm:$0x1]  ;;  %s3461_s20 = sld [smem:[#allocation5 + $0xf]] }
  0xc6   :  { %1258 = vrot.lane.b32.xlu1 %v1257_v1, %s2523_s11  ;;  %v1285_v16 = vld [vmem:[%s1284_s17] sm:$0x1]  ;;  %s3463_s13 = sld [smem:[#allocation5 + $0x13]] }
  0xc7   :  { %s1328_s23 = scalar_lea.vmem %s3608_s1, %s2280_s10 }
  0xc8   :  { %v1329_v18 = vld [vmem:[%s1328_s23] sm:$0x1]  ;;  %s1246_s16 = scalar_lea.vmem %s3608_s1, %s2265_s14 }
  0xc9   :  { %1236 = vrot.lane.b32.xlu0 %v1235_v2, %s2523_s11  ;;  %s1390_s17 = scalar_lea.vmem %s3608_s1, %s2291_s26  ;;  %v1247_v48 = vld [vmem:[%s1246_s16] sm:$0x1] }
  0xca   :  { %1302 = vrot.lane.b32.xlu1 %v1301_v3, %s2523_s11  ;;  %s1434_s22 = scalar_lea.vmem %s3608_s1, %s2299_s25  ;;  %v1391_v49 = vld [vmem:[%s1390_s17] sm:$0x1]  ;;  %s1456_s25 = scalar_lea.vmem %s3608_s1, %s3450_s29 }
  0xcb   :  { %v1435_v54 = vld [vmem:[%s1434_s22] sm:$0x1]  ;;  %s1312_s7 = scalar_lea.vmem %s3608_s1, %s3461_s20 }
  0xcc   :  { %v1457_v2 = vld [vmem:[%s1456_s25] sm:$0x1] }
  0xcd   :  { %1280 = vrot.lane.b32.xlu0 %v1279_v4, %s2523_s11 }
  0xce   :  { %1340 = vrot.lane.b32.xlu1 %v1339_v5, %s2522_s24  ;;  %s1344_s24 = scalar_lea.vmem %s3608_s1, %s2283_s30  ;;  %s3448_s30 = sld [smem:[#allocation5 + $0x7]] }
  0xcf   :  { %v1345_v17 = vld [vmem:[%s1344_s24] sm:$0x1] }
  0xd1   :  { %1324 = vrot.lane.b32.xlu0 %v1323_v6, %s2523_s11 }
  0xd2   :  { %1386 = vrot.lane.b32.xlu1 %v1385_v7, %s2524_s21 }
  0xd4   :  { %s1268_s18 = scalar_lea.vmem %s3608_s1, %s3448_s30 }
  0xd5   :  { %1364 = vrot.lane.b32.xlu0 %v1363_v8, %s2524_s21  ;;  %v1269_v61 = vld [vmem:[%s1268_s18] sm:$0x1] }
  0xd6   :  { %1430 = vrot.lane.b32.xlu1 %v1429_v9, %s2524_s21 }
  0xd9   :  { %1408 = vrot.lane.b32.xlu0 %v1407_v10, %s2524_s21 }
  0xda   :  { %1468 = vrot.lane.b32.xlu1 %v1467_v11, %s2523_s11 }
  0xdd   :  { %1452 = vrot.lane.b32.xlu0 %v1451_v12, %s2524_s21 }
  0xde   :  { %1264 = vrot.lane.b32.xlu1 %v1263_v13, %s2524_s21 }
  0xe1   :  { %1242 = vrot.lane.b32.xlu0 %v1241_v14, %s2524_s21  ;;  %v1313_v14 = vld [vmem:[%s1312_s7] sm:$0x1] }
  0xe2   :  { %1308 = vrot.lane.b32.xlu1 %v1307_v15, %s2524_s21 }
  0xe5   :  { %1286 = vrot.lane.b32.xlu0 %v1285_v16, %s2524_s21 }
  0xe6   :  { %1346 = vrot.lane.b32.xlu1 %v1345_v17, %s2523_s11  ;;  %s2287_s11 = sld [smem:[#allocation5 + $0x19]] }
  0xe9   :  { %1330 = vrot.lane.b32.xlu0 %v1329_v18, %s2524_s21  ;;  %s2295_s21 = sld [smem:[#allocation5 + $0x21]] }
  0xec   :  { %s1368_s28 = scalar_lea.vmem %s3608_s1, %s2287_s11 }
  0xed   :  { %v1369_v43 = vld [vmem:[%s1368_s28] sm:$0x1] }
  0xef   :  { %s1412_s10 = scalar_lea.vmem %s3608_s1, %s2295_s21  ;;  %s1290_s21 = scalar_lea.vmem %s3608_s1, %s3446_s0 }
  0xf0   :  { %v1413_v47 = vld [vmem:[%s1412_s10] sm:$0x1]  ;;  %s1334_s10 = scalar_lea.vmem %s3608_s1, %s3463_s13 }
  0xf1   :  { %v1291_v59 = vld [vmem:[%s1290_s21] sm:$0x1] }
 0x118   :  { %v1419_v19 = vpop.permute.xlu1 %1418 }
 0x119   :  { %v1420_v53 = vadd.f32 %v1419_v19, %v1413_v47 }
 0x11b   :  { %v1375_v20 = vpop.permute.xlu0 %1374 }
 0x11c   :  { %v1441_v21 = vpop.permute.xlu1 %1440  ;;  %v1376_v45 = vadd.f32 %v1375_v20, %v1369_v43  ;;  %v1335_v20 = vld [vmem:[%s1334_s10] sm:$0x1] }
 0x11d   :  { %v1442_v0 = vadd.f32 %v1441_v21, %v1435_v54 }
 0x11f   :  { %v1397_v22 = vpop.permute.xlu0 %1396 }
 0x120   :  { %v3425_v23 = vpop.permute.xlu1 %1274  ;;  %v1398_v58 = vadd.f32 %v1397_v22, %v1391_v49 }
 0x121   :  { %v1276_v10 = vadd.f32 %v3425_v23, %v1269_v61 }
 0x123   :  { %v1253_v24 = vpop.permute.xlu0 %1252 }
 0x124   :  { %v3427_v25 = vpop.permute.xlu1 %1318  ;;  %v1254_v55 = vadd.f32 %v1253_v24, %v1247_v48 }
 0x127   :  { %v3429_v26 = vpop.permute.xlu0 %1296 }
 0x128   :  { %v1359_v27 = vpop.permute.xlu1 %1358  ;;  %v1298_v5 = vadd.f32 %v3429_v26, %v1291_v59 }
 0x12b   :  { %v1353_v28 = vpop.permute.xlu0 %1352 }
 0x12c   :  { %v1403_v29 = vpop.permute.xlu1 %1402  ;;  %v1360_v51 = vadd.f32 %v1359_v27, %v1353_v28 }
 0x12d   :  { %v1404_v1 = vadd.f32 %v1403_v29, %v1398_v58 }
 0x12f   :  { %v1381_v30 = vpop.permute.xlu0 %1380 }
 0x130   :  { %v3431_v31 = vpop.permute.xlu1 %1446  ;;  %v1382_v50 = vadd.f32 %v1381_v30, %v1376_v45  ;;  %v1320_v30 = vadd.f32 %v3427_v25, %v1313_v14 }
 0x131   :  { %v1448_v18 = vadd.f32 %v3431_v31, %v1442_v0 }
 0x133   :  { %v1425_v32 = vpop.permute.xlu0 %1424 }
 0x134   :  { %v1231_v33 = vpop.permute.xlu1 %1230  ;;  %v1426_v62 = vadd.f32 %v1425_v32, %v1420_v53 }
 0x137   :  { %v3433_v34 = vpop.permute.xlu0 %1462 }
 0x138   :  { %v1259_v35 = vpop.permute.xlu1 %1258  ;;  %v1464_v15 = vadd.f32 %v3433_v34, %v1457_v2 }
 0x139   :  { %v1260_v63 = vadd.f32 %v1259_v35, %v1254_v55 }
 0x13b   :  { %v1237_v36 = vpop.permute.xlu0 %1236 }
 0x13c   :  { %v3435_v37 = vpop.permute.xlu1 %1302  ;;  %v1238_v3 = vadd.f32 %v1237_v36, %v1231_v33 }
 0x13d   :  { %v1304_v16 = vadd.f32 %v3435_v37, %v1298_v5 }
 0x13f   :  { %v3437_v38 = vpop.permute.xlu0 %1280 }
 0x140   :  { %v3439_v39 = vpop.permute.xlu1 %1340  ;;  %v1282_v19 = vadd.f32 %v3437_v38, %v1276_v10 }
 0x141   :  { %v1342_v31 = vadd.f32 %v3439_v39, %v1335_v20 }
 0x143   :  { %v3441_v40 = vpop.permute.xlu0 %1324 }
 0x144   :  { %v1387_v41 = vpop.permute.xlu1 %1386  ;;  %v1326_v36 = vadd.f32 %v3441_v40, %v1320_v30 }
 0x145   :  { %v1388_v56 = vadd.f32 %v1387_v41, %v1382_v50 }
 0x147   :  { %v1365_v42 = vpop.permute.xlu0 %1364  ;;  %v1478_v6 = vrot.slane %v1388_v56, 7 }
 0x148   :  { %v1431_v44 = vpop.permute.xlu1 %1430  ;;  %v1366_v60 = vadd.f32 %v1365_v42, %v1360_v51 }
 0x149   :  { %v1432_v7 = vadd.f32 %v1431_v44, %v1426_v62 }
 0x14a   :  { %v1477_v11 = vrot.slane %v1366_v60, 7 }
 0x14b   :  { %v1409_v46 = vpop.permute.xlu0 %1408  ;;  %v1480_v23 = vrot.slane %v1432_v7, 7 }
 0x14c   :  { %v1469_v52 = vpop.permute.xlu1 %1468  ;;  %v1410_v12 = vadd.f32 %v1409_v46, %v1404_v1 }
 0x14d   :  { %v1470_v26 = vadd.f32 %v1469_v52, %v1464_v15 }
 0x14e   :  { %v1479_v32 = vrot.slane %v1410_v12, 7 }
 0x14f   :  { %v1453_v57 = vpop.permute.xlu0 %1452  ;;  %v1482_v42 = vrot.slane %v1470_v26, 7 }
 0x150   :  { %v1265_v4 = vpop.permute.xlu1 %1264  ;;  %v1454_v33 = vadd.f32 %v1453_v57, %v1448_v18 }
 0x151   :  { %v1266_v9 = vadd.f32 %v1265_v4, %v1260_v63 }
 0x152   :  { %v1481_v25 = vrot.slane %v1454_v33, 7 }
 0x153   :  { %v1243_v8 = vpop.permute.xlu0 %1242  ;;  %v1491_v17 = vsel %vm1489_vm0, %v1266_v9, %v1478_v6 }
 0x154   :  { %v1244_v13 = vadd.f32 %v1243_v8, %v1238_v3  ;;  %v1497_v22 = vpack.c.bf16 %v1491_v17, %v1491_v17  ;;  %v1309_v24 = vpop.permute.xlu1 %1308 }
 0x155   :  { %v1310_v29 = vadd.f32 %v1309_v24, %v1304_v16 }
 0x156   :  { %v1490_v21 = vsel %vm1489_vm0, %v1244_v13, %v1477_v11 }
 0x157   :  { %v3496_v27 = vpack.c.bf16 %v1490_v21, %v1490_v21  ;;  %v1287_v28 = vpop.permute.xlu0 %1286  ;;  %v1493_v35 = vsel %vm1489_vm0, %v1310_v29, %v1480_v23 }
 0x158   :  { %v1288_v34 = vadd.f32 %v1287_v28, %v1282_v19  ;;  %v3503_v38 = vpack.c.bf16 %v1493_v35, %v1493_v35  ;;  %v1347_v41 = vpop.permute.xlu1 %1346 }
 0x159   :  { %v1348_v45 = vadd.f32 %v1347_v41, %v1342_v31 }
 0x15a   :  { %v1492_v37 = vsel %vm1489_vm0, %v1288_v34, %v1479_v32 }
 0x15b   :  { %v3505_v43 = vpack.c.bf16 %v1492_v37, %v1492_v37  ;;  %v1331_v44 = vpop.permute.xlu0 %1330  ;;  %v1495_v47 = vsel %vm1489_vm0, %v1348_v45, %v1482_v42 }
 0x15c   :  { %v1332_v46 = vadd.f32 %v1331_v44, %v1326_v36  ;;  %v3509_v48 = vpack.c.bf16 %v1495_v47, %v1495_v47 }
 0x15e   :  { %v1494_v39 = vsel %vm1489_vm0, %v1332_v46, %v1481_v25 }
 0x15f   :  { %v3511_v49 = vpack.c.bf16 %v1494_v39, %v1494_v39 }
 0x160   :  { %2517 = dma.done.wait [#allocation3], 18432 }
 0x161   :  { %2518 = vsyncadd [#allocation3], 4294948864  ;;  %1699 = vmatprep.mubr.bf16.mxu0 %v1497_v22  ;;  %1822 = vmatprep.mubr.bf16.mxu1 %v1497_v22  ;;  %v1507_v40 = vld [vmem:[#allocation2 + $0x8] sm:$0xff]  ;;  %v1506_v50 = vld [vmem:[#allocation2] sm:$0xff]  ;;  %vm2526_vm1 = vmmov 0   ;;  %vm2099_vm2 = vcmask 785408  }
 0x162   :  { %v1510_v51 = vld [vmem:[#allocation2 + $0x20] sm:$0xff]  ;;  %1667 = vmatprep.subr.bf16.mxu0 %v1507_v40  ;;  %v1509_v52 = vld [vmem:[#allocation2 + $0x18] sm:$0xff]  ;;  %v1512_v54 = vld [vmem:[#allocation2 + $0x30] sm:$0xff]  ;;  %s2527_s25 = smov [#allocation6]   ;;  %vm2183_vm3 = vcmask 58368  }
 0x163   :  { %1668 = vmatpush1.bf16.msra.mxu0 %v1506_v50  ;;  %v1513_v53 = vld [vmem:[#allocation2 + $0x38] sm:$0xff]  ;;  %v1516_v55 = vld [vmem:[#allocation2 + $0x50] sm:$0xff]  ;;  %v1515_v58 = vld [vmem:[#allocation2 + $0x48] sm:$0xff]  ;;  %s2191_s0 = sshll.u32 %s2527_s25, 4  ;;  %s2192_s0 = int_to_ptr.vmem [resolvable:$true] %s2191_s0 }
 0x164   :  { %1669 = vmatprep.subr.bf16.mxu0 %v1510_v51  ;;  %v1532_v56 = vld [vmem:[#allocation2 + $0xd0] sm:$0xff]  ;;  %v1535_v59 = vld [vmem:[#allocation2 + $0xe8] sm:$0xff]  ;;  %v1538_v62 = vld [vmem:[#allocation2 + $0x100] sm:$0xff]  ;;  %p2498_p6 = scmp.lt.s32.totalorder %s2192_s0, %s2192_s0 }
 0x165   :  { %v1508_v57 = vld [vmem:[#allocation2 + $0x10] sm:$0xff]  ;;  %2331 = vmatprep.subr.bf16.mxu1 %v1532_v56  ;;  %v1519_v60 = vld [vmem:[#allocation2 + $0x68] sm:$0xff]  ;;  %v1518_v63 = vld [vmem:[#allocation2 + $0x60] sm:$0xff] }
 0x166   :  { %2332 = vmatpush3.bf16.msra.mxu1 %v1508_v57  ;;  %v1511_v61 = vld [vmem:[#allocation2 + $0x28] sm:$0xff]  ;;  %v1522_v0 = vld [vmem:[#allocation2 + $0x80] sm:$0xff]  ;;  %v1541_v2 = vld [vmem:[#allocation2 + $0x118] sm:$0xff] }
 0x167   :  { %1670 = vmatpush1.bf16.msra.mxu0 %v1509_v52  ;;  %2333 = vmatprep.subr.bf16.mxu1 %v1535_v59  ;;  %v1514_v1 = vld [vmem:[#allocation2 + $0x40] sm:$0xff]  ;;  %v1521_v3 = vld [vmem:[#allocation2 + $0x78] sm:$0xff]  ;;  %v1544_v6 = vld [vmem:[#allocation2 + $0x130] sm:$0xff] }
 0x168   :  { %1671 = vmatprep.subr.bf16.mxu0 %v1513_v53  ;;  %v1525_v4 = vld [vmem:[#allocation2 + $0x98] sm:$0xff]  ;;  %v1524_v7 = vld [vmem:[#allocation2 + $0x90] sm:$0xff]  ;;  %v1547_v10 = vld [vmem:[#allocation2 + $0x148] sm:$0xff] }
 0x169   :  { %v1517_v5 = vld [vmem:[#allocation2 + $0x58] sm:$0xff]  ;;  %v1528_v8 = vld [vmem:[#allocation2 + $0xb0] sm:$0xff]  ;;  %v1527_v11 = vld [vmem:[#allocation2 + $0xa8] sm:$0xff] }
 0x16a   :  { %2334 = vmatpush3.bf16.msra.mxu1 %v1511_v61  ;;  %v1520_v9 = vld [vmem:[#allocation2 + $0x70] sm:$0xff]  ;;  %v1531_v12 = vld [vmem:[#allocation2 + $0xc8] sm:$0xff]  ;;  %v1550_v14 = vld [vmem:[#allocation2 + $0x160] sm:$0xff] }
 0x16b   :  { %1672 = vmatpush1.bf16.msra.mxu0 %v1512_v54  ;;  %2335 = vmatprep.subr.bf16.mxu1 %v1538_v62  ;;  %v1523_v13 = vld [vmem:[#allocation2 + $0x88] sm:$0xff]  ;;  %v1530_v15 = vld [vmem:[#allocation2 + $0xc0] sm:$0xff]  ;;  %v1553_v18 = vld [vmem:[#allocation2 + $0x178] sm:$0xff] }
 0x16c   :  { %1673 = vmatprep.subr.bf16.mxu0 %v1516_v55  ;;  %v1534_v16 = vld [vmem:[#allocation2 + $0xe0] sm:$0xff]  ;;  %v1533_v19 = vld [vmem:[#allocation2 + $0xd8] sm:$0xff]  ;;  %v1580_v22 = vld [vmem:[#allocation2 + $0x250] sm:$0xff] }
 0x16d   :  { %v1526_v17 = vld [vmem:[#allocation2 + $0xa0] sm:$0xff]  ;;  %v1537_v20 = vld [vmem:[#allocation2 + $0xf8] sm:$0xff]  ;;  %v1536_v24 = vld [vmem:[#allocation2 + $0xf0] sm:$0xff] }
 0x16e   :  { %2336 = vmatpush3.bf16.msra.mxu1 %v1514_v1  ;;  %v1529_v21 = vld [vmem:[#allocation2 + $0xb8] sm:$0xff]  ;;  %v1540_v23 = vld [vmem:[#allocation2 + $0x110] sm:$0xff]  ;;  %v1583_v28 = vld [vmem:[#allocation2 + $0x268] sm:$0xff] }
 0x16f   :  { %1674 = vmatpush1.bf16.msra.mxu0 %v1515_v58  ;;  %2337 = vmatprep.subr.bf16.mxu1 %v1541_v2  ;;  %v1556_v26 = vld [vmem:[#allocation2 + $0x190] sm:$0xff]  ;;  %v1539_v29 = vld [vmem:[#allocation2 + $0x108] sm:$0xff]  ;;  %v1542_v32 = vld [vmem:[#allocation2 + $0x120] sm:$0xff] }
 0x170   :  { %1675 = vmatprep.subr.bf16.mxu0 %v1519_v60  ;;  %v1543_v30 = vld [vmem:[#allocation2 + $0x128] sm:$0xff]  ;;  %v1546_v34 = vld [vmem:[#allocation2 + $0x140] sm:$0xff]  ;;  %v1545_v36 = vld [vmem:[#allocation2 + $0x138] sm:$0xff] }
 0x171   :  { %v1559_v33 = vld [vmem:[#allocation2 + $0x1a8] sm:$0xff]  ;;  %v1586_v31 = vld [vmem:[#allocation2 + $0x280] sm:$0xff]  ;;  %v1549_v37 = vld [vmem:[#allocation2 + $0x158] sm:$0xff] }
 0x172   :  { %2338 = vmatpush3.bf16.msra.mxu1 %v1517_v5  ;;  %v1562_v35 = vld [vmem:[#allocation2 + $0x1c0] sm:$0xff]  ;;  %v1589_v41 = vld [vmem:[#allocation2 + $0x298] sm:$0xff]  ;;  %v1548_v44 = vld [vmem:[#allocation2 + $0x150] sm:$0xff] }
 0x173   :  { %1676 = vmatpush1.bf16.msra.mxu0 %v1518_v63  ;;  %2339 = vmatprep.subr.bf16.mxu1 %v1544_v6  ;;  %v1565_v42 = vld [vmem:[#allocation2 + $0x1d8] sm:$0xff]  ;;  %v1552_v45 = vld [vmem:[#allocation2 + $0x170] sm:$0xff]  ;;  %v1551_v47 = vld [vmem:[#allocation2 + $0x168] sm:$0xff] }
 0x174   :  { %1677 = vmatprep.subr.bf16.mxu0 %v1522_v0  ;;  %v1592_v25 = vld [vmem:[#allocation2 + $0x2b0] sm:$0xff]  ;;  %v1555_v39 = vld [vmem:[#allocation2 + $0x188] sm:$0xff]  ;;  %v1598_v51 = vld [vmem:[#allocation2 + $0x2e0] sm:$0xff] }
 0x175   :  { %v1568_v46 = vld [vmem:[#allocation2 + $0x1f0] sm:$0xff]  ;;  %v1595_v40 = vld [vmem:[#allocation2 + $0x2c8] sm:$0xff]  ;;  %v1554_v52 = vld [vmem:[#allocation2 + $0x180] sm:$0xff] }
 0x176   :  { %2340 = vmatpush3.bf16.msra.mxu1 %v1520_v9  ;;  %v1571_v50 = vld [vmem:[#allocation2 + $0x208] sm:$0xff]  ;;  %v1558_v53 = vld [vmem:[#allocation2 + $0x1a0] sm:$0xff]  ;;  %v1601_v55 = vld [vmem:[#allocation2 + $0x2f8] sm:$0xff] }
 0x177   :  { %1678 = vmatpush1.bf16.msra.mxu0 %v1521_v3  ;;  %2341 = vmatprep.subr.bf16.mxu1 %v1547_v10  ;;  %v1574_v54 = vld [vmem:[#allocation2 + $0x220] sm:$0xff]  ;;  %v1557_v56 = vld [vmem:[#allocation2 + $0x198] sm:$0xff]  ;;  %v1628_v59 = vld [vmem:[#allocation2 + $0x3d0] sm:$0xff] }
 0x178   :  { %1679 = vmatprep.subr.bf16.mxu0 %v1525_v4  ;;  %v1561_v57 = vld [vmem:[#allocation2 + $0x1b8] sm:$0xff]  ;;  %v1560_v60 = vld [vmem:[#allocation2 + $0x1b0] sm:$0xff]  ;;  %v1631_v62 = vld [vmem:[#allocation2 + $0x3e8] sm:$0xff] }
 0x179   :  { %v1577_v58 = vld [vmem:[#allocation2 + $0x238] sm:$0xff]  ;;  %v1564_v61 = vld [vmem:[#allocation2 + $0x1d0] sm:$0xff]  ;;  %v1563_v63 = vld [vmem:[#allocation2 + $0x1c8] sm:$0xff] }
 0x17a   :  { %2342 = vmatpush3.bf16.msra.mxu1 %v1523_v13  ;;  %v1607_v0 = vld [vmem:[#allocation2 + $0x328] sm:$0xff]  ;;  %v1634_v1 = vld [vmem:[#allocation2 + $0x400] sm:$0xff]  ;;  %v1637_v5 = vld [vmem:[#allocation2 + $0x418] sm:$0xff] }
 0x17b   :  { %1680 = vmatpush1.bf16.msra.mxu0 %v1524_v7  ;;  %2343 = vmatprep.subr.bf16.mxu1 %v1550_v14  ;;  %v1566_v2 = vld [vmem:[#allocation2 + $0x1e0] sm:$0xff]  ;;  %v1569_v6 = vld [vmem:[#allocation2 + $0x1f8] sm:$0xff]  ;;  %v1640_v9 = vld [vmem:[#allocation2 + $0x430] sm:$0xff] }
 0x17c   :  { %1681 = vmatprep.subr.bf16.mxu0 %v1528_v8  ;;  %v1570_v3 = vld [vmem:[#allocation2 + $0x200] sm:$0xff]  ;;  %v1573_v7 = vld [vmem:[#allocation2 + $0x218] sm:$0xff]  ;;  %v1572_v10 = vld [vmem:[#allocation2 + $0x210] sm:$0xff] }
 0x17d   :  { %v1610_v4 = vld [vmem:[#allocation2 + $0x340] sm:$0xff]  ;;  %v1613_v8 = vld [vmem:[#allocation2 + $0x358] sm:$0xff]  ;;  %v1643_v13 = vld [vmem:[#allocation2 + $0x448] sm:$0xff] }
 0x17e   :  { %2344 = vmatpush3.bf16.msra.mxu1 %v1526_v17  ;;  %v1575_v14 = vld [vmem:[#allocation2 + $0x228] sm:$0xff]  ;;  %v1646_v17 = vld [vmem:[#allocation2 + $0x460] sm:$0xff] }
 0x17f   :  { %1682 = vmatpush1.bf16.msra.mxu0 %v1527_v11  ;;  %2345 = vmatprep.subr.bf16.mxu1 %v1553_v18  ;;  %v1576_v11 = vld [vmem:[#allocation2 + $0x230] sm:$0xff]  ;;  %v1578_v18 = vld [vmem:[#allocation2 + $0x240] sm:$0xff] }
 0x180   :  { %1683 = vmatprep.subr.bf16.mxu0 %v1531_v12  ;;  %v1616_v12 = vld [vmem:[#allocation2 + $0x370] sm:$0xff] }
 0x182   :  { %2346 = vmatpush3.bf16.msra.mxu1 %v1529_v21  ;;  %v1649_v21 = vld [vmem:[#allocation2 + $0x478] sm:$0xff] }
 0x183   :  { %1684 = vmatpush1.bf16.msra.mxu0 %v1530_v15  ;;  %2353 = vmatprep.subr.bf16.mxu1 %v1580_v22  ;;  %v1579_v15 = vld [vmem:[#allocation2 + $0x248] sm:$0xff]  ;;  %v1581_v22 = vld [vmem:[#allocation2 + $0x258] sm:$0xff] }
 0x184   :  { %1685 = vmatprep.subr.bf16.mxu0 %v1534_v16  ;;  %v1619_v16 = vld [vmem:[#allocation2 + $0x388] sm:$0xff] }
 0x185   :  { %1823 = vmatmul.mubr.bf16.vlgmr.msra.gmra.mrb[0].mxu1 %v3496_v27 }
 0x186   :  { %2354 = vmatpush3.bf16.msra.mxu1 %v1556_v26  ;;  %1862 = vmatprep.mubr.bf16.mxu1 %v3503_v38  ;;  %v1584_v26 = vld [vmem:[#allocation2 + $0x270] sm:$0xff] }
 0x187   :  { %1686 = vmatpush1.bf16.msra.mxu0 %v1533_v19  ;;  %2355 = vmatprep.subr.bf16.mxu1 %v1583_v28  ;;  %v1582_v19 = vld [vmem:[#allocation2 + $0x260] sm:$0xff]  ;;  %v1588_v28 = vld [vmem:[#allocation2 + $0x290] sm:$0xff] }
 0x188   :  { %1687 = vmatprep.subr.bf16.mxu0 %v1537_v20  ;;  %v1622_v20 = vld [vmem:[#allocation2 + $0x3a0] sm:$0xff] }
 0x18a   :  { %2356 = vmatpush3.bf16.msra.mxu1 %v1559_v33  ;;  %v1594_v33 = vld [vmem:[#allocation2 + $0x2c0] sm:$0xff] }
 0x18b   :  { %1688 = vmatpush1.bf16.msra.mxu0 %v1536_v24  ;;  %2357 = vmatprep.subr.bf16.mxu1 %v1586_v31  ;;  %v1585_v24 = vld [vmem:[#allocation2 + $0x278] sm:$0xff] }
 0x18c   :  { %1689 = vmatprep.subr.bf16.mxu0 %v1540_v23  ;;  %v1625_v23 = vld [vmem:[#allocation2 + $0x3b8] sm:$0xff] }
 0x18d   :  { %v1597_v31 = vld [vmem:[#allocation2 + $0x2d8] sm:$0xff] }
 0x18e   :  { %2358 = vmatpush3.bf16.msra.mxu1 %v1562_v35  ;;  %v1596_v35 = vld [vmem:[#allocation2 + $0x2d0] sm:$0xff] }
 0x18f   :  { %1690 = vmatpush1.bf16.msra.mxu0 %v1539_v29  ;;  %2359 = vmatprep.subr.bf16.mxu1 %v1589_v41  ;;  %v1587_v29 = vld [vmem:[#allocation2 + $0x288] sm:$0xff] }
 0x190   :  { %1691 = vmatprep.subr.bf16.mxu0 %v1543_v30  ;;  %v1591_v30 = vld [vmem:[#allocation2 + $0x2a8] sm:$0xff] }
 0x191   :  { %v1603_v41 = vld [vmem:[#allocation2 + $0x308] sm:$0xff] }
 0x192   :  { %2360 = vmatpush3.bf16.msra.mxu1 %v1565_v42  ;;  %v1602_v42 = vld [vmem:[#allocation2 + $0x300] sm:$0xff] }
 0x193   :  { %1692 = vmatpush1.bf16.msra.mxu0 %v1542_v32  ;;  %2361 = vmatprep.subr.bf16.mxu1 %v1592_v25  ;;  %v1590_v32 = vld [vmem:[#allocation2 + $0x2a0] sm:$0xff]  ;;  %v1609_v25 = vld [vmem:[#allocation2 + $0x338] sm:$0xff] }
 0x194   :  { %1693 = vmatprep.subr.bf16.mxu0 %v1546_v34  ;;  %v1593_v34 = vld [vmem:[#allocation2 + $0x2b8] sm:$0xff] }
 0x196   :  { %2362 = vmatpush3.bf16.msra.mxu1 %v1568_v46  ;;  %v1608_v46 = vld [vmem:[#allocation2 + $0x330] sm:$0xff] }
 0x197   :  { %1694 = vmatpush1.bf16.msra.mxu0 %v1545_v36  ;;  %2363 = vmatprep.subr.bf16.mxu1 %v1595_v40  ;;  %v1600_v36 = vld [vmem:[#allocation2 + $0x2f0] sm:$0xff]  ;;  %v1615_v40 = vld [vmem:[#allocation2 + $0x368] sm:$0xff] }
 0x198   :  { %1695 = vmatprep.subr.bf16.mxu0 %v1549_v37  ;;  %v1599_v37 = vld [vmem:[#allocation2 + $0x2e8] sm:$0xff] }
 0x19a   :  { %2364 = vmatpush3.bf16.msra.mxu1 %v1571_v50  ;;  %v1614_v50 = vld [vmem:[#allocation2 + $0x360] sm:$0xff] }
 0x19b   :  { %1696 = vmatpush1.bf16.msra.mxu0 %v1548_v44  ;;  %2365 = vmatprep.subr.bf16.mxu1 %v1598_v51  ;;  %v1606_v44 = vld [vmem:[#allocation2 + $0x320] sm:$0xff] }
 0x19c   :  { %1697 = vmatprep.subr.bf16.mxu0 %v1552_v45  ;;  %v1605_v45 = vld [vmem:[#allocation2 + $0x318] sm:$0xff]  ;;  %v1618_v51 = vld [vmem:[#allocation2 + $0x380] sm:$0xff] }
 0x19e   :  { %2366 = vmatpush3.bf16.msra.mxu1 %v1574_v54  ;;  %v1623_v54 = vld [vmem:[#allocation2 + $0x3a8] sm:$0xff] }
 0x19f   :  { %1698 = vmatpush1.bf16.msra.mxu0 %v1551_v47  ;;  %2367 = vmatprep.subr.bf16.mxu1 %v1601_v55  ;;  %v1612_v47 = vld [vmem:[#allocation2 + $0x350] sm:$0xff]  ;;  %v1627_v55 = vld [vmem:[#allocation2 + $0x3c8] sm:$0xff] }
 0x1a0   :  { %1708 = vmatprep.subr.bf16.mxu0 %v1555_v39  ;;  %v1611_v39 = vld [vmem:[#allocation2 + $0x348] sm:$0xff] }
 0x1a2   :  { %1700 = vmatmul.mubr.bf16.vlgmr.msra.gmra.mrb[0].mxu0 %v3496_v27  ;;  %2368 = vmatpush3.bf16.msra.mxu1 %v1577_v58  ;;  %v1604_v27 = vld [vmem:[#allocation2 + $0x310] sm:$0xff]  ;;  %v1629_v58 = vld [vmem:[#allocation2 + $0x3d8] sm:$0xff] }
 0x1a3   :  { %1709 = vmatpush1.bf16.msra.mxu0 %v1554_v52  ;;  %1740 = vmatprep.mubr.bf16.mxu0 %v3503_v38  ;;  %v1567_v38 = vld [vmem:[#allocation2 + $0x1e8] sm:$0xff]  ;;  %v1621_v52 = vld [vmem:[#allocation2 + $0x398] sm:$0xff] }
 0x1a4   :  { %1710 = vmatprep.subr.bf16.mxu0 %v1558_v53  ;;  %2375 = vmatprep.subr.bf16.mxu1 %v1628_v59  ;;  %v1624_v53 = vld [vmem:[#allocation2 + $0x3b0] sm:$0xff]  ;;  %v1633_v59 = vld [vmem:[#allocation2 + $0x3f8] sm:$0xff] }
 0x1a5   :  { %1863 = vmatmul.mubr.bf16.vlgmr.msra.gmra.mrb[4].mxu1 %v3505_v43 }
 0x1a6   :  { %2376 = vmatpush3.bf16.msra.mxu1 %v1604_v27  ;;  %1902 = vmatprep.mubr.bf16.mxu1 %v3509_v48  ;;  %v1635_v27 = vld [vmem:[#allocation2 + $0x408] sm:$0xff] }
 0x1a7   :  { %1711 = vmatpush1.bf16.msra.mxu0 %v1557_v56  ;;  %2377 = vmatprep.subr.bf16.mxu1 %v1631_v62  ;;  %v1626_v56 = vld [vmem:[#allocation2 + $0x3c0] sm:$0xff]  ;;  %v1639_v62 = vld [vmem:[#allocation2 + $0x428] sm:$0xff] }
 0x1a8   :  { %1712 = vmatprep.subr.bf16.mxu0 %v1561_v57  ;;  %v1630_v57 = vld [vmem:[#allocation2 + $0x3e0] sm:$0xff] }
 0x1aa   :  { %2378 = vmatpush3.bf16.msra.mxu1 %v1607_v0  ;;  %v1641_v0 = vld [vmem:[#allocation2 + $0x438] sm:$0xff] }
 0x1ab   :  { %1713 = vmatpush1.bf16.msra.mxu0 %v1560_v60  ;;  %2379 = vmatprep.subr.bf16.mxu1 %v1634_v1  ;;  %v1632_v60 = vld [vmem:[#allocation2 + $0x3f0] sm:$0xff]  ;;  %v1645_v1 = vld [vmem:[#allocation2 + $0x458] sm:$0xff] }
 0x1ac   :  { %1714 = vmatprep.subr.bf16.mxu0 %v1564_v61  ;;  %v1636_v61 = vld [vmem:[#allocation2 + $0x410] sm:$0xff] }
 0x1ae   :  { %2380 = vmatpush3.bf16.msra.mxu1 %v1610_v4  ;;  %v1647_v4 = vld [vmem:[#allocation2 + $0x468] sm:$0xff] }
 0x1af   :  { %1715 = vmatpush1.bf16.msra.mxu0 %v1563_v63  ;;  %2381 = vmatprep.subr.bf16.mxu1 %v1637_v5  ;;  %v1638_v63 = vld [vmem:[#allocation2 + $0x420] sm:$0xff] }
 0x1b0   :  { %1716 = vmatprep.subr.bf16.mxu0 %v1567_v38  ;;  %v1642_v38 = vld [vmem:[#allocation2 + $0x440] sm:$0xff] }
 0x1b1   :  { %v2459_v5 = vld [vmem:[%s3611_s4 + $0x40] sm:$0xff]  }
 0x1b2   :  { %2382 = vmatpush3.bf16.msra.mxu1 %v1613_v8  ;;  %v2462_v8 = vld [vmem:[%s3611_s4 + $0x8] sm:$0xff]  }
 0x1b3   :  { %1717 = vmatpush1.bf16.msra.mxu0 %v1566_v2  ;;  %2383 = vmatprep.subr.bf16.mxu1 %v1640_v9  ;;  %v1644_v2 = vld [vmem:[#allocation2 + $0x450] sm:$0xff] }
 0x1b4   :  { %1718 = vmatprep.subr.bf16.mxu0 %v1570_v3  ;;  %v1648_v3 = vld [vmem:[#allocation2 + $0x470] sm:$0xff] }
 0x1b5   :  { %v2464_v9 = vld [vmem:[%s3611_s4 + $0x10] sm:$0xff]  }
 0x1b6   :  { %2384 = vmatpush3.bf16.msra.mxu1 %v1616_v12  ;;  %v2467_v12 = vld [vmem:[%s3611_s4 + $0x60] sm:$0xff]  }
 0x1b7   :  { %1719 = vmatpush1.bf16.msra.mxu0 %v1569_v6  ;;  %2385 = vmatprep.subr.bf16.mxu1 %v1643_v13  ;;  %v2460_v6 = vld [vmem:[%s3611_s4] sm:$0xff]  }
 0x1b8   :  { %1720 = vmatprep.subr.bf16.mxu0 %v1573_v7  ;;  %v2461_v7 = vld [vmem:[%s3611_s4 + $0x48] sm:$0xff]   ;;  %v2468_v13 = vld [vmem:[%s3611_s4 + $0x20] sm:$0xff]  }
 0x1ba   :  { %2386 = vmatpush3.bf16.msra.mxu1 %v1619_v16 }
 0x1bb   :  { %1721 = vmatpush1.bf16.msra.mxu0 %v1572_v10  ;;  %2387 = vmatprep.subr.bf16.mxu1 %v1646_v17  ;;  %v2465_v10 = vld [vmem:[%s3611_s4 + $0x58] sm:$0xff]  }
 0x1bc   :  { %1722 = vmatprep.subr.bf16.mxu0 %v1576_v11  ;;  %v2466_v11 = vld [vmem:[%s3611_s4 + $0x18] sm:$0xff]  }
 0x1be   :  { %2388 = vmatpush3.bf16.msra.mxu1 %v1622_v20 }
 0x1bf   :  { %1723 = vmatpush1.bf16.msra.mxu0 %v1575_v14  ;;  %2389 = vmatprep.subr.bf16.mxu1 %v1649_v21  ;;  %v2469_v14 = vld [vmem:[%s3611_s4 + $0x68] sm:$0xff]   ;;  %v1652_v21 = vlaneseq }
 0x1c0   :  { %1724 = vmatprep.subr.bf16.mxu0 %v1579_v15  ;;  %v2470_v15 = vld [vmem:[%s3611_s4 + $0x28] sm:$0xff]  }
 0x1c2   :  { %2390 = vmatpush3.bf16.msra.mxu1 %v1625_v23  ;;  %v2472_v23 = vld [vmem:[%s3611_s4 + $0x30] sm:$0xff]  }
 0x1c3   :  { %1725 = vmatpush1.bf16.msra.mxu0 %v1578_v18  ;;  %2397 = vmatprep.subr.bf16.mxu1 %v2459_v5 }
 0x1c4   :  { %1726 = vmatprep.subr.bf16.mxu0 %v1582_v19 }
 0x1c5   :  { %1903 = vmatmul.mubr.bf16.vlgmr.msra.gmra.mrb[8].mxu1 %v3511_v49 }
 0x1c6   :  { %2398 = vmatpush3.bf16.msra.mxu1 %v2460_v6 }
 0x1c7   :  { %1727 = vmatpush1.bf16.msra.mxu0 %v1581_v22  ;;  %2399 = vmatprep.subr.bf16.mxu1 %v2461_v7  ;;  %v1653_v22 = vshrl.u32 %v1652_v21, 7 }
 0x1c8   :  { %1728 = vmatprep.subr.bf16.mxu0 %v1585_v24  ;;  %v2471_v24 = vld [vmem:[%s3611_s4 + $0x70] sm:$0xff]  }
 0x1ca   :  { %2400 = vmatpush3.bf16.msra.mxu1 %v2462_v8  ;;  %v2306_v8 = vld [vmem:[%s3612_s5] ss:$0 sm:$0xff] }
 0x1cb   :  { %1729 = vmatpush1.bf16.msra.mxu0 %v1584_v26  ;;  %v1662_v26 = vsub.s32 2, %v1653_v22 }
 0x1cc   :  { %1730 = vmatprep.subr.bf16.mxu0 %v1588_v28  ;;  %v2473_v28 = vld [vmem:[%s3611_s4 + $0x78] sm:$0xff]  }
 0x1cf   :  { %1731 = vmatpush1.bf16.msra.mxu0 %v1587_v29  ;;  %v1650_v29 = vld [vmem:[%s3610_s3] sm:$0x7] }
 0x1d0   :  { %1732 = vmatprep.subr.bf16.mxu0 %v1591_v30  ;;  %v2474_v30 = vld [vmem:[%s3611_s4 + $0x38] sm:$0xff]  }
 0x1d3   :  { %1733 = vmatpush1.bf16.msra.mxu0 %v1590_v32  ;;  %v1663_v32 = vrot.slane %v1650_v29, %v1662_v26 }
 0x1d4   :  { %1734 = vmatprep.subr.bf16.mxu0 %v1594_v33  ;;  %v2525_v33 = vmov 0.0  }
 0x1d7   :  { %1735 = vmatpush1.bf16.msra.mxu0 %v1593_v34 }
 0x1d8   :  { %1736 = vmatprep.subr.bf16.mxu0 %v1597_v31 }
 0x1db   :  { %1737 = vmatpush1.bf16.msra.mxu0 %v1596_v35 }
 0x1dc   :  { %1738 = vmatprep.subr.bf16.mxu0 %v1600_v36 }
 0x1df   :  { %1739 = vmatpush1.bf16.msra.mxu0 %v1599_v37 }
 0x1e0   :  { %1749 = vmatprep.subr.bf16.mxu0 %v1603_v41 }
 0x1e2   :  { %1741 = vmatmul.mubr.bf16.vlgmr.msra.gmra.mrb[0].mxu0 %v3505_v43  ;;  %v1617_v43 = vld [vmem:[#allocation2 + $0x378] sm:$0xff] }
 0x1e3   :  { %1750 = vmatpush1.bf16.msra.mxu0 %v1602_v42  ;;  %1781 = vmatprep.mubr.bf16.mxu0 %v3509_v48  ;;  %v1620_v48 = vld [vmem:[#allocation2 + $0x390] sm:$0xff] }
 0x1e4   :  { %1751 = vmatprep.subr.bf16.mxu0 %v1606_v44 }
 0x1e7   :  { %1752 = vmatpush1.bf16.msra.mxu0 %v1605_v45 }
 0x1e8   :  { %1753 = vmatprep.subr.bf16.mxu0 %v1609_v25 }
 0x1eb   :  { %1754 = vmatpush1.bf16.msra.mxu0 %v1608_v46 }
 0x1ec   :  { %1755 = vmatprep.subr.bf16.mxu0 %v1612_v47 }
 0x1ef   :  { %1756 = vmatpush1.bf16.msra.mxu0 %v1611_v39 }
 0x1f0   :  { %1757 = vmatprep.subr.bf16.mxu0 %v1615_v40  ;;  %v1654_v40 = vsub.s32 0, %v1653_v22 }
 0x1f3   :  { %1758 = vmatpush1.bf16.msra.mxu0 %v1614_v50  ;;  %v1658_v50 = vsub.s32 1, %v1653_v22 }
 0x1f4   :  { %1759 = vmatprep.subr.bf16.mxu0 %v1618_v51  ;;  %v1655_v51 = vrot.slane %v1650_v29, %v1654_v40 }
 0x1f7   :  { %1760 = vmatpush1.bf16.msra.mxu0 %v1617_v43  ;;  %v1659_v43 = vrot.slane %v1650_v29, %v1658_v50 }
 0x1f8   :  { %1761 = vmatprep.subr.bf16.mxu0 %v1621_v52 }
 0x1fb   :  { %1762 = vmatpush1.bf16.msra.mxu0 %v1620_v48 }
 0x1fc   :  { %1763 = vmatprep.subr.bf16.mxu0 %v1624_v53 }
 0x1ff   :  { %1764 = vmatpush1.bf16.msra.mxu0 %v1623_v54 }
 0x200   :  { %1765 = vmatprep.subr.bf16.mxu0 %v1627_v55 }
 0x203   :  { %1766 = vmatpush1.bf16.msra.mxu0 %v1626_v56 }
 0x204   :  { %1767 = vmatprep.subr.bf16.mxu0 %v1630_v57 }
 0x207   :  { %1768 = vmatpush1.bf16.msra.mxu0 %v1629_v58 }
 0x208   :  { %1769 = vmatprep.subr.bf16.mxu0 %v1633_v59 }
 0x20b   :  { %1770 = vmatpush1.bf16.msra.mxu0 %v1632_v60  ;;  %v2475_v60 = vld [vmem:[%s3611_s4 + $0x80] sm:$0xff]  }
 0x20c   :  { %1771 = vmatprep.subr.bf16.mxu0 %v1636_v61 }
 0x20f   :  { %1772 = vmatpush1.bf16.msra.mxu0 %v1635_v27  ;;  %v2476_v27 = vld [vmem:[%s3611_s4 + $0x88] sm:$0xff]  }
 0x210   :  { %1773 = vmatprep.subr.bf16.mxu0 %v1639_v62  ;;  %v2477_v62 = vld [vmem:[%s3611_s4 + $0x90] sm:$0xff]  }
 0x213   :  { %1774 = vmatpush1.bf16.msra.mxu0 %v1638_v63  ;;  %v2478_v63 = vld [vmem:[%s3611_s4 + $0x98] sm:$0xff]  }
 0x214   :  { %1775 = vmatprep.subr.bf16.mxu0 %v1642_v38  ;;  %v2479_v38 = vld [vmem:[%s3611_s4 + $0xa0] sm:$0xff]  }
 0x217   :  { %1776 = vmatpush1.bf16.msra.mxu0 %v1641_v0  ;;  %v2480_v0 = vld [vmem:[%s3611_s4 + $0xa8] sm:$0xff]  }
 0x218   :  { %1777 = vmatprep.subr.bf16.mxu0 %v1645_v1 }
 0x21b   :  { %1778 = vmatpush1.bf16.msra.mxu0 %v1644_v2 }
 0x21c   :  { %1779 = vmatprep.subr.bf16.mxu0 %v1648_v3 }
 0x21f   :  { %1780 = vmatpush1.bf16.msra.mxu0 %v1647_v4 }
 0x222   :  { %1782 = vmatmul.mubr.bf16.vlgmr.msra.gmra.mrb[0].mxu0 %v3511_v49  ;;  %v2463_v49 = vld [vmem:[%s3611_s4 + $0x50] sm:$0xff]   ;;  %s2493_s4 = scalar_lea.vmem %s2192_s0, 32 }
 0x223   :  { %2401 = vmatprep.subr.bf16.mxu1 %v2463_v49  ;;  %p2494_p5 = scmp.ne.s32.totalorder %s2192_s0, %s2493_s4  ;;  %p2499_p7 = scmp.lt.s32.totalorder %s2493_s4, %s2493_s4 }
 0x224   :  { %2402 = vmatpush3.bf16.msra.mxu1 %v2464_v9 }
 0x225   :  { %2403 = vmatprep.subr.bf16.mxu1 %v2465_v10  ;;  %p2500_p8 = por %p2499_p7, %p2498_p6 }
 0x227   :  { %p2501_p9 = pnand %p2500_p8, %p2494_p5 }
 0x228   :  { %2404 = vmatpush3.bf16.msra.mxu1 %v2466_v11 }
 0x229   :  { %2405 = vmatprep.subr.bf16.mxu1 %v2467_v12 }
 0x22c   :  { %2406 = vmatpush3.bf16.msra.mxu1 %v2468_v13 }
 0x22d   :  { %2407 = vmatprep.subr.bf16.mxu1 %v2469_v14 }
 0x230   :  { %2408 = vmatpush3.bf16.msra.mxu1 %v2470_v15 }
 0x231   :  { %2409 = vmatprep.subr.bf16.mxu1 %v2471_v24 }
 0x234   :  { %2410 = vmatpush3.bf16.msra.mxu1 %v2472_v23 }
 0x235   :  { %2411 = vmatprep.subr.bf16.mxu1 %v2473_v28 }
 0x238   :  { %2412 = vmatpush3.bf16.msra.mxu1 %v2474_v30 }
 0x239   :  { %2426 = vmatprep.subr.bf16.mxu1 %v2525_v33 }
 0x258   :  { %v2347_v16 = vpop.f32.mrb[0].mxu1 }
 0x259   :  { %v2348_v17 = vpop.f32.mrb[1].mxu1 }
 0x25a   :  { %v2349_v18 = vadd.f32 %v2348_v17, %v2347_v16  ;;  %v2350_v19 = vpop.f32.mrb[2].mxu1 }
 0x25b   :  { %v2351_v20 = vpop.f32.mrb[3].mxu1 }
 0x25c   :  { %v1825_v34 = vadd.f32 %v2349_v18, %v1663_v32 }
 0x278   :  { %v2369_v31 = vpop.f32.mrb[4].mxu1 }
 0x279   :  { %v2370_v35 = vpop.f32.mrb[5].mxu1 }
 0x27a   :  { %v2371_v36 = vadd.f32 %v2370_v35, %v2369_v31  ;;  %v2372_v37 = vpop.f32.mrb[6].mxu1 }
 0x27b   :  { %v2373_v41 = vpop.f32.mrb[7].mxu1 }
 0x27c   :  { %v1865_v42 = vadd.f32 %v2371_v36, %v1825_v34 }
 0x298   :  { %v2391_v44 = vpop.f32.mrb[8].mxu1 }
 0x299   :  { %v2392_v45 = vpop.f32.mrb[9].mxu1 }
 0x29a   :  { %v2393_v25 = vadd.f32 %v2392_v45, %v2391_v44  ;;  %v2394_v46 = vpop.f32.mrb[10].mxu1 }
 0x29b   :  { %v2395_v47 = vpop.f32.mrb[11].mxu1 }
 0x29c   :  { %v1905_v39 = vadd.f32 %v2393_v25, %v1865_v42 }
 0x29e   :  { %v1912_v1 = vmax.f32 %v1905_v39, 0.0 }
 0x2a0   :  { %v1915_v2 = vpack.c.bf16 %v1912_v1, %v1912_v1 }
 0x2f5   :  { %v1783_v52 = vpop.f32.mrb[0].mxu0 }
 0x2f6   :  { %v2442_v48 = vadd.f32 %v1783_v52, %v1655_v51  ;;  %v1785_v53 = vpop.f32.mrb[1].mxu0 }
 0x2f7   :  { %v2443_v54 = vadd.f32 %v1785_v53, %v1659_v43  ;;  %v1787_v55 = vpop.f32.mrb[2].mxu0 }
 0x2f8   :  { %v1910_v56 = vmax.f32 %v2442_v48, 0.0  ;;  %v1788_v57 = vpop.f32.mrb[3].mxu0 }
 0x2f9   :  { %v1911_v58 = vmax.f32 %v2443_v54, 0.0 }
 0x2fa   :  { %v1913_v61 = vpack.c.bf16 %v1910_v56, %v1910_v56 }
 0x2fb   :  { %v1914_v59 = vpack.c.bf16 %v1911_v58, %v1911_v58 }
 0x2fd   :  { %2135 = vmatprep.mubr.bf16.mxu1 %v1914_v59 }
 0x2fe   :  { %2136 = vmatmul.mubr.bf16.vlgmr.msra.gmra.mrb[12].mxu1 %v1913_v61 }
 0x2ff   :  { %2427 = vmatpush3.bf16.msra.mxu1 %v2475_v60  ;;  %2438 = vmatprep.mubr.msk.bf16.mxu1 %vm2526_vm1, %v2525_v33 }
 0x300   :  { %2428 = vmatprep.subr.bf16.mxu1 %v2525_v33 }
 0x303   :  { %2429 = vmatpush3.bf16.msra.mxu1 %v2476_v27 }
 0x304   :  { %2430 = vmatprep.subr.bf16.mxu1 %v2525_v33 }
 0x307   :  { %2431 = vmatpush3.bf16.msra.mxu1 %v2477_v62 }
 0x308   :  { %2432 = vmatprep.subr.bf16.mxu1 %v2525_v33 }
 0x30b   :  { %2433 = vmatpush3.bf16.msra.mxu1 %v2478_v63 }
 0x30c   :  { %2434 = vmatprep.subr.bf16.mxu1 %v2525_v33 }
 0x30f   :  { %2435 = vmatpush3.bf16.msra.mxu1 %v2479_v38 }
 0x310   :  { %2436 = vmatprep.subr.bf16.mxu1 %v2525_v33 }
 0x313   :  { %2437 = vmatpush3.bf16.msra.mxu1 %v2480_v0 }
 0x316   :  { %2439 = vmatmul.mubr.msk.bf16.vlgmr.msra.gmra.mrb[16].mxu1 %vm2099_vm2, %v1915_v2 }
 0x3d1   :  { %v2413_v3 = vpop.f32.mrb[12].mxu1 }
 0x3d2   :  { %v2414_v4 = vpop.f32.mrb[13].mxu1 }
 0x3d3   :  { %v2415_v5 = vadd.f32 %v2414_v4, %v2413_v3  ;;  %v2416_v6 = vpop.f32.mrb[14].mxu1 }
 0x3d4   :  { %v2417_v7 = vpop.f32.mrb[15].mxu1 }
 0x3d5   :  { %v2138_v49 = vadd.f32 %v2415_v5, %v2306_v8 }
 0x3e9   :  { %v2177_v9 = vpop.f32.mrb[16].mxu1 }
 0x3ea   :  { %v2178_v10 = vadd.f32 %v2177_v9, %v2138_v49  ;;  %v2440_v11 = vpop.f32.mrb[17].mxu1 }
 0x3eb   :  { %v2180_v12 = vpop.f32.mrb[18].mxu1 }
 0x3ec   :  { %v2441_v13 = vpop.f32.mrb[19].mxu1  ;;  %2184 = vst.msk [vmem:[#allocation6] sm:$0x3] %vm2183_vm3, %v2178_v10 }
 0x3ed   :  { %2504 = shalt.err (!%p2501_p9)
}
 0x3ee   :  { %s2505_s7 = scalar_lea.hbm %s3613_s6, 32 }
 0x3ef   :  { %p2506_p10 = scmp.ne.s32.totalorder %s3613_s6, %s2505_s7  ;;  %p2509_p11 = scmp.lt.u32.totalorder %s2505_s7, %s3613_s6 }
 0x3f1   :  { %p2511_p12 = pnand %p2509_p11, %p2506_p10 }
 0x3f3   :  { %2514 = shalt.err (!%p2511_p12)
}
 0x3f4   :  { %2194 = dma.vmem_to_hbm [thread:$0]  %s2192_s0, 32, %s3613_s6, [#allocation7]  }
 0x3f5   :  { %2519 = dma.done.wait [#allocation7], 32  }
 0x3f6   :  { %2520 = vsyncadd [#allocation7], 4294967264 }
 0x3f7   :  { %2198 = vsyncpa [#allocation7], 1 }
 0x3f8   :  { %2199 = vsyncmov [#allocation3] }
 0x3fb   :  { %s2200_s16 = vpop.sfrf %2199 }
 0x3fc   :  { %p2330_p13 = scmp.ne.s32.totalorder %s2200_s16, 0 }
 0x3fe   :  { %2204 = shalt.err (%p2330_p13)  }

</bundles_post_ra>
